<compile_context>
chip_gen: v7x
topology: tpu7x:2x2x1
jax: 0.10.0
libtpu: 0.0.40
codegen_flags: <defaults>
</compile_context>

<pallas_src>
import numpy as np
import jax
import jax.numpy as jnp
from jax.experimental import pallas as pl
from jax.experimental.pallas import tpu as pltpu

# ----------------------------- config (small) -----------------------------
VOCAB = 50
D_MODEL = 32          # == embed_dim == d_model
N_LAYERS = 2
N_HEAD = 4
D_K = 8
D_V = 8
D_INNER = 64
PAD_IDX = 0
N_POSITION = 200
EPS = 1e-6            # LayerNorm eps (matches the module: eps=1e-06)


# ------------------------- positional encoding table ----------------------
def _sinusoid_table(n_position, d_hid):
    pos = np.arange(n_position, dtype=np.float64)[:, None]
    idx = np.arange(d_hid, dtype=np.float64)[None, :]
    angle = pos / np.power(10000.0, 2.0 * (idx // 2) / d_hid)
    tbl = np.zeros((n_position, d_hid), dtype=np.float32)
    tbl[:, 0::2] = np.sin(angle[:, 0::2])
    tbl[:, 1::2] = np.cos(angle[:, 1::2])
    return jnp.asarray(tbl, dtype=jnp.float32)


# ------------------------------ kernel helpers -----------------------------
def _layer_norm(x, g, b):
    mu = jnp.mean(x, axis=-1, keepdims=True)
    var = jnp.mean((x - mu) ** 2, axis=-1, keepdims=True)
    return (x - mu) * jax.lax.rsqrt(var + EPS) * g + b


def _mm(a, b):
    # bf16 operands (native on the MXU for v5e/v6e/v7x), f32 accumulation.
    return jnp.dot(a.astype(jnp.bfloat16), b.astype(jnp.bfloat16),
                   preferred_element_type=jnp.float32)


def _bmm(eq, a, b):
    # Batched matmul (leading batch axis), bf16 operands, f32 accumulation.
    return jnp.einsum(eq, a.astype(jnp.bfloat16), b.astype(jnp.bfloat16),
                      preferred_element_type=jnp.float32)


# ------------------------------ fused kernel -------------------------------
def _make_fused_kernel(with_attn):
    scale = 1.0 / float(np.sqrt(D_K))

    def kernel(x_ref, pos_ref, mask_ref,
               wq_ref, wk_ref, wv_ref, wo_ref,
               ln1_g_ref, ln1_b_ref,
               w1_ref, b1_ref, w2_ref, b2_ref,
               ln2_g_ref, ln2_b_ref,
               lnf_g_ref, lnf_b_ref,
               out_ref, *attn_refs):
        S = x_ref.shape[1]
        x = x_ref[0] + pos_ref[...]                        # (S, D) emb + pos

        # Additive key-padding bias, computed once for all layers and heads.
        key_mask = mask_ref[0]                             # (1, S)
        bias = jnp.where(key_mask == 0.0, -1e9, 0.0)       # (1, S)

        for l in range(N_LAYERS):                          # unrolled layer loop
            # ---- multi-head self-attention (head = leading batch axis) ----
            xb = x.astype(jnp.bfloat16)
            xh = jnp.broadcast_to(xb[None], (N_HEAD, S, D_MODEL))   # (H, S, D)
            qh = _bmm('hsd,hdk->hsk', xh, wq_ref[l])       # (H, S, dk)
            kh = _bmm('hsd,hdk->hsk', xh, wk_ref[l])       # (H, S, dk)
            vh = _bmm('hsd,hdk->hsk', xh, wv_ref[l])       # (H, S, dv)

            scores = _bmm('hqd,hkd->hqk', qh * scale, kh)  # (H, S, S)
            scores = scores + bias                         # key mask, all heads
            m = jnp.max(scores, axis=-1, keepdims=True)
            e = jnp.exp(scores - m)
            attn = e / jnp.sum(e, axis=-1, keepdims=True)  # softmax over keys

            if with_attn:                                  # only when requested
                attn_refs[0][0, l] = attn                  # (H, S, S)

            ctx = _bmm('hqk,hkd->hqd', attn, vh)           # (H, S, dv)
            per_head = _bmm('hqd,hdo->hqo', ctx, wo_ref[l])  # (H, S, D)
            mha = jnp.sum(per_head, axis=0)                # output projection
            x1 = _layer_norm(mha + x, ln1_g_ref[l], ln1_b_ref[l])    # post-LN

            # ---- position-wise feed-forward ----
            h1 = jnp.maximum(_mm(x1, w1_ref[l]) + b1_ref[l], 0.0)    # ReLU
            ffn = _mm(h1, w2_ref[l]) + b2_ref[l]
            x = _layer_norm(ffn + x1, ln2_g_ref[l], ln2_b_ref[l])    # post-LN

        out_ref[0] = _layer_norm(x, lnf_g_ref[...], lnf_b_ref[...])  # final LN

    return kernel


# ------------------------------- wrappers ----------------------------------
def _full_spec(arr):
    n = arr.ndim
    return pl.BlockSpec(arr.shape, lambda b, n=n: (0,) * n)


def encoder_fused(x_emb, pos_slice, mask, layers, lnf_g, lnf_b, return_attn):
    B, S, D = x_emb.shape
    weights = [layers["wq"], layers["wk"], layers["wv"], layers["wo"],
               layers["ln1_g"], layers["ln1_b"],
               layers["w1"], layers["b1"], layers["w2"], layers["b2"],
               layers["ln2_g"], layers["ln2_b"],
               lnf_g, lnf_b]
    in_specs = ([pl.BlockSpec((1, S, D), lambda b: (b, 0, 0)),
                 _full_spec(pos_slice),
                 pl.BlockSpec((1, 1, S), lambda b: (b, 0, 0))]
                + [_full_spec(w) for w in weights])
    if return_attn:
        out_shape = (jax.ShapeDtypeStruct((B, S, D), jnp.float32),
                     jax.ShapeDtypeStruct((B, N_LAYERS, N_HEAD, S, S),
                                          jnp.float32))
        out_specs = (pl.BlockSpec((1, S, D), lambda b: (b, 0, 0)),
                     pl.BlockSpec((1, N_LAYERS, N_HEAD, S, S),
                                  lambda b: (b, 0, 0, 0, 0)))
    else:
        out_shape = jax.ShapeDtypeStruct((B, S, D), jnp.float32)
        out_specs = pl.BlockSpec((1, S, D), lambda b: (b, 0, 0))

    return pl.pallas_call(
        _make_fused_kernel(return_attn),
        grid=(B,),                                   # v7x: one batch elem / TC
        in_specs=in_specs,
        out_specs=out_specs,
        out_shape=out_shape,
        compiler_params=pltpu.CompilerParams(dimension_semantics=("parallel",)),
    )(x_emb, pos_slice, mask, *weights)


# ------------------------------- parameters --------------------------------
def init_params(key):
    keys = jax.random.split(key, 1 + N_LAYERS * 6)
    embed = jax.random.normal(keys[0], (VOCAB, D_MODEL), jnp.float32) * 0.1
    embed = embed.at[PAD_IDX].set(0.0)   # nn.Embedding padding_idx row is zero

    def one_layer(ks):
        kq, kk, kv, ko, k1, k2 = ks
        return dict(
            # attention weights pre-split per head: (H, D, d_k/d_v), (H, d_v, D)
            wq=jax.random.normal(kq, (N_HEAD, D_MODEL, D_K), jnp.float32) * 0.1,
            wk=jax.random.normal(kk, (N_HEAD, D_MODEL, D_K), jnp.float32) * 0.1,
            wv=jax.random.normal(kv, (N_HEAD, D_MODEL, D_V), jnp.float32) * 0.1,
            wo=jax.random.normal(ko, (N_HEAD, D_V, D_MODEL), jnp.float32) * 0.1,
            ln1_g=jnp.ones((1, D_MODEL), jnp.float32),
            ln1_b=jnp.zeros((1, D_MODEL), jnp.float32),
            w1=jax.random.normal(k1, (D_MODEL, D_INNER), jnp.float32) * 0.1,
            b1=jnp.zeros((1, D_INNER), jnp.float32),
            w2=jax.random.normal(k2, (D_INNER, D_MODEL), jnp.float32) * 0.1,
            b2=jnp.zeros((1, D_MODEL), jnp.float32),
            ln2_g=jnp.ones((1, D_MODEL), jnp.float32),
            ln2_b=jnp.zeros((1, D_MODEL), jnp.float32),
        )

    per_layer = [one_layer(keys[1 + 6 * l: 1 + 6 * (l + 1)])
                 for l in range(N_LAYERS)]
    # Stack per-layer params into (L, ...) arrays so a single fused pallas_call
    # receives everything and loops over layers inside the kernel.
    layers = {name: jnp.stack([lp[name] for lp in per_layer])
              for name in per_layer[0]}
    return dict(embed=embed,
                pos=_sinusoid_table(N_POSITION, D_MODEL),
                layers=layers,
                ln_g=jnp.ones((1, D_MODEL), jnp.float32),
                ln_b=jnp.zeros((1, D_MODEL), jnp.float32))


# -------------------------------- forward ----------------------------------
def encoder_forward(params, in_seq, mask, return_attn=False):
    # Embedding lookup kept as a plain-JAX gather (tiny glue op; the PAD row of
    # the table is zero, matching nn.Embedding(padding_idx=...)).
    x = jnp.take(params["embed"], in_seq, axis=0).astype(jnp.float32)  # (B,S,D)
    S = in_seq.shape[1]
    # TODO(synk): nn.Dropout omitted -- eval/inference mode is identity.
    res = encoder_fused(x, params["pos"][:S], mask, params["layers"],
                        params["ln_g"], params["ln_b"], return_attn)
    if return_attn:
        enc_out, attn_all = res                      # attn_all: (B, L, H, S, S)
        attn_list = [attn_all[:, l] for l in range(N_LAYERS)]   # (B, H, S, S)
        return (enc_out, attn_list)
    return (res,)


if __name__ == "__main__":
    B, S = 2, 8
    key = jax.random.PRNGKey(0)
    pkey, skey = jax.random.split(key)
    params = init_params(pkey)

    in_seq = jax.random.randint(skey, (B, S), 1, VOCAB)
    in_seq = in_seq.at[:, -2:].set(PAD_IDX)                 # some padded tokens
    mask = (in_seq != PAD_IDX).astype(jnp.float32)[:, None, :]   # (B, 1, S)

    # default path: no attention maps materialized
    (enc_out,) = encoder_forward(params, in_seq, mask)
    jax.block_until_ready(enc_out)
    assert enc_out.shape == (B, S, D_MODEL)

    # opt-in path: attention maps returned per layer
    enc_out2, attn_list = encoder_forward(params, in_seq, mask, return_attn=True)
    jax.block_until_ready(enc_out2)
    assert len(attn_list) == N_LAYERS
    assert attn_list[0].shape == (B, N_HEAD, S, S)

    print("KERNEL_OK")
</pallas_src>

<mosaic_0001>
module attributes {stable_mosaic.version = 11 : i64} {
  func.func @kernel(%arg0: i32, %arg1: memref<1x8x32xf32, #tpu.memory_space<vmem>>, %arg2: memref<8x32xf32, #tpu.memory_space<vmem>>, %arg3: memref<1x1x8xf32, #tpu.memory_space<vmem>>, %arg4: memref<2x4x32x8xf32, #tpu.memory_space<vmem>>, %arg5: memref<2x4x32x8xf32, #tpu.memory_space<vmem>>, %arg6: memref<2x4x32x8xf32, #tpu.memory_space<vmem>>, %arg7: memref<2x4x8x32xf32, #tpu.memory_space<vmem>>, %arg8: memref<2x1x32xf32, #tpu.memory_space<vmem>>, %arg9: memref<2x1x32xf32, #tpu.memory_space<vmem>>, %arg10: memref<2x32x64xf32, #tpu.memory_space<vmem>>, %arg11: memref<2x1x64xf32, #tpu.memory_space<vmem>>, %arg12: memref<2x64x32xf32, #tpu.memory_space<vmem>>, %arg13: memref<2x1x32xf32, #tpu.memory_space<vmem>>, %arg14: memref<2x1x32xf32, #tpu.memory_space<vmem>>, %arg15: memref<2x1x32xf32, #tpu.memory_space<vmem>>, %arg16: memref<1x32xf32, #tpu.memory_space<vmem>>, %arg17: memref<1x32xf32, #tpu.memory_space<vmem>>, %arg18: memref<1x8x32xf32, #tpu.memory_space<vmem>>) attributes {dimension_semantics = [#tpu.dimension_semantics<parallel>], iteration_bounds = array<i64: 2>, scalar_prefetch = 0 : i64, scratch_operands = 0 : i64, tpu.core_type = #tpu.core_type<tc>, window_params = [{transform_indices = @transform_0, window_bounds = array<i64: 1, 8, 32>}, {pipeline_mode = #tpu.pipeline_mode<synchronous>, transform_indices = @transform_1, window_bounds = array<i64: 8, 32>}, {transform_indices = @transform_2, window_bounds = array<i64: 1, 1, 8>}, {pipeline_mode = #tpu.pipeline_mode<synchronous>, transform_indices = @transform_3, window_bounds = array<i64: 2, 4, 32, 8>}, {pipeline_mode = #tpu.pipeline_mode<synchronous>, transform_indices = @transform_4, window_bounds = array<i64: 2, 4, 32, 8>}, {pipeline_mode = #tpu.pipeline_mode<synchronous>, transform_indices = @transform_5, window_bounds = array<i64: 2, 4, 32, 8>}, {pipeline_mode = #tpu.pipeline_mode<synchronous>, transform_indices = @transform_6, window_bounds = array<i64: 2, 4, 8, 32>}, {pipeline_mode = #tpu.pipeline_mode<synchronous>, transform_indices = @transform_7, window_bounds = array<i64: 2, 1, 32>}, {pipeline_mode = #tpu.pipeline_mode<synchronous>, transform_indices = @transform_8, window_bounds = array<i64: 2, 1, 32>}, {pipeline_mode = #tpu.pipeline_mode<synchronous>, transform_indices = @transform_9, window_bounds = array<i64: 2, 32, 64>}, {pipeline_mode = #tpu.pipeline_mode<synchronous>, transform_indices = @transform_10, window_bounds = array<i64: 2, 1, 64>}, {pipeline_mode = #tpu.pipeline_mode<synchronous>, transform_indices = @transform_11, window_bounds = array<i64: 2, 64, 32>}, {pipeline_mode = #tpu.pipeline_mode<synchronous>, transform_indices = @transform_12, window_bounds = array<i64: 2, 1, 32>}, {pipeline_mode = #tpu.pipeline_mode<synchronous>, transform_indices = @transform_13, window_bounds = array<i64: 2, 1, 32>}, {pipeline_mode = #tpu.pipeline_mode<synchronous>, transform_indices = @transform_14, window_bounds = array<i64: 2, 1, 32>}, {pipeline_mode = #tpu.pipeline_mode<synchronous>, transform_indices = @transform_15, window_bounds = array<i64: 1, 32>}, {pipeline_mode = #tpu.pipeline_mode<synchronous>, transform_indices = @transform_16, window_bounds = array<i64: 1, 32>}, {transform_indices = @transform_17, window_bounds = array<i64: 1, 8, 32>}]} {
    %c0 = arith.constant 0 : index
    %c0_0 = arith.constant 0 : index
    %c0_1 = arith.constant 0 : index
    %0 = vector.load %arg1[%c0, %c0_0, %c0_1] : memref<1x8x32xf32, #tpu.memory_space<vmem>>, vector<1x8x32xf32>
    %1 = vector.shape_cast %0 : vector<1x8x32xf32> to vector<8x32xf32>
    %c0_2 = arith.constant 0 : index
    %c0_3 = arith.constant 0 : index
    %2 = vector.load %arg2[%c0_2, %c0_3] : memref<8x32xf32, #tpu.memory_space<vmem>>, vector<8x32xf32>
    %3 = arith.addf %1, %2 : vector<8x32xf32>
    %c0_4 = arith.constant 0 : index
    %c0_5 = arith.constant 0 : index
    %c0_6 = arith.constant 0 : index
    %4 = vector.load %arg3[%c0_4, %c0_5, %c0_6] : memref<1x1x8xf32, #tpu.memory_space<vmem>>, vector<1x1x8xf32>
    %5 = vector.shape_cast %4 : vector<1x1x8xf32> to vector<1x8xf32>
    %cst = arith.constant 0.000000e+00 : f32
    %6 = vector.broadcast %cst : f32 to vector<1x8xf32>
    %7 = arith.cmpf oeq, %5, %6 : vector<1x8xf32>
    %cst_7 = arith.constant -1.000000e+09 : f32
    %cst_8 = arith.constant 0.000000e+00 : f32
    %8 = vector.broadcast %cst_7 : f32 to vector<1x8xf32>
    %9 = vector.broadcast %cst_8 : f32 to vector<1x8xf32>
    %10 = arith.select %7, %8, %9 : vector<1x8xi1>, vector<1x8xf32>
    %11 = arith.truncf %3 : vector<8x32xf32> to vector<8x32xbf16>
    %12 = vector.shape_cast %11 : vector<8x32xbf16> to vector<1x8x32xbf16>
    %13 = vector.shape_cast %12 : vector<1x8x32xbf16> to vector<1x8x32xbf16>
    %14 = vector.broadcast %13 : vector<1x8x32xbf16> to vector<4x8x32xbf16>
    %c0_9 = arith.constant 0 : index
    %c0_10 = arith.constant 0 : index
    %c0_11 = arith.constant 0 : index
    %c0_12 = arith.constant 0 : index
    %15 = vector.load %arg4[%c0_9, %c0_10, %c0_11, %c0_12] : memref<2x4x32x8xf32, #tpu.memory_space<vmem>>, vector<1x4x32x8xf32>
    %16 = vector.shape_cast %15 : vector<1x4x32x8xf32> to vector<4x32x8xf32>
    %17 = arith.truncf %16 : vector<4x32x8xf32> to vector<4x32x8xbf16>
    "tpu.trace_start"() <{level = 10 : i32, message = "hsd,hdk->hsk"}> : () -> ()
    %cst_13 = arith.constant dense<0.000000e+00> : vector<4x8x8xf32>
    %18 = tpu.matmul %14, %17, %cst_13 {dimension_numbers = #tpu.dot_dimension_numbers<[2], [1], [1], [2], [0, 0, 0, 1, 1, 2], [0], [0]>} : vector<4x8x32xbf16>, vector<4x32x8xbf16>, vector<4x8x8xf32> -> vector<4x8x8xf32>
    "tpu.trace_stop"() : () -> ()
    %c0_14 = arith.constant 0 : index
    %c0_15 = arith.constant 0 : index
    %c0_16 = arith.constant 0 : index
    %c0_17 = arith.constant 0 : index
    %19 = vector.load %arg5[%c0_14, %c0_15, %c0_16, %c0_17] : memref<2x4x32x8xf32, #tpu.memory_space<vmem>>, vector<1x4x32x8xf32>
    %20 = vector.shape_cast %19 : vector<1x4x32x8xf32> to vector<4x32x8xf32>
    %21 = arith.truncf %20 : vector<4x32x8xf32> to vector<4x32x8xbf16>
    "tpu.trace_start"() <{level = 10 : i32, message = "hsd,hdk->hsk"}> : () -> ()
    %cst_18 = arith.constant dense<0.000000e+00> : vector<4x8x8xf32>
    %22 = tpu.matmul %14, %21, %cst_18 {dimension_numbers = #tpu.dot_dimension_numbers<[2], [1], [1], [2], [0, 0, 0, 1, 1, 2], [0], [0]>} : vector<4x8x32xbf16>, vector<4x32x8xbf16>, vector<4x8x8xf32> -> vector<4x8x8xf32>
    "tpu.trace_stop"() : () -> ()
    %c0_19 = arith.constant 0 : index
    %c0_20 = arith.constant 0 : index
    %c0_21 = arith.constant 0 : index
    %c0_22 = arith.constant 0 : index
    %23 = vector.load %arg6[%c0_19, %c0_20, %c0_21, %c0_22] : memref<2x4x32x8xf32, #tpu.memory_space<vmem>>, vector<1x4x32x8xf32>
    %24 = vector.shape_cast %23 : vector<1x4x32x8xf32> to vector<4x32x8xf32>
    %25 = arith.truncf %24 : vector<4x32x8xf32> to vector<4x32x8xbf16>
    "tpu.trace_start"() <{level = 10 : i32, message = "hsd,hdk->hsk"}> : () -> ()
    %cst_23 = arith.constant dense<0.000000e+00> : vector<4x8x8xf32>
    %26 = tpu.matmul %14, %25, %cst_23 {dimension_numbers = #tpu.dot_dimension_numbers<[2], [1], [1], [2], [0, 0, 0, 1, 1, 2], [0], [0]>} : vector<4x8x32xbf16>, vector<4x32x8xbf16>, vector<4x8x8xf32> -> vector<4x8x8xf32>
    "tpu.trace_stop"() : () -> ()
    %cst_24 = arith.constant 0.353553385 : f32
    %27 = vector.broadcast %cst_24 : f32 to vector<4x8x8xf32>
    %28 = arith.mulf %18, %27 : vector<4x8x8xf32>
    %29 = arith.truncf %28 : vector<4x8x8xf32> to vector<4x8x8xbf16>
    %30 = arith.truncf %22 : vector<4x8x8xf32> to vector<4x8x8xbf16>
    "tpu.trace_start"() <{level = 10 : i32, message = "hqd,hkd->hqk"}> : () -> ()
    %cst_25 = arith.constant dense<0.000000e+00> : vector<4x8x8xf32>
    %31 = tpu.matmul %29, %30, %cst_25 {dimension_numbers = #tpu.dot_dimension_numbers<[2], [2], [1], [1], [0, 0, 0, 1, 1, 1], [0], [0]>} : vector<4x8x8xbf16>, vector<4x8x8xbf16>, vector<4x8x8xf32> -> vector<4x8x8xf32>
    "tpu.trace_stop"() : () -> ()
    %32 = vector.shape_cast %10 : vector<1x8xf32> to vector<1x1x8xf32>
    %33 = vector.broadcast %32 : vector<1x1x8xf32> to vector<4x8x8xf32>
    %34 = arith.addf %31, %33 : vector<4x8x8xf32>
    %cst_26 = arith.constant dense<0xFF800000> : vector<4x8xf32>
    %35 = vector.multi_reduction <maximumf>, %34, %cst_26 [2] : vector<4x8x8xf32> to vector<4x8xf32>
    %36 = vector.shape_cast %35 : vector<4x8xf32> to vector<4x8x1xf32>
    %37 = vector.broadcast %36 : vector<4x8x1xf32> to vector<4x8x8xf32>
    %38 = arith.subf %34, %37 : vector<4x8x8xf32>
    %39 = math.exp %38 : vector<4x8x8xf32>
    %cst_27 = arith.constant dense<0.000000e+00> : vector<4x8xf32>
    %40 = vector.multi_reduction <add>, %39, %cst_27 [2] : vector<4x8x8xf32> to vector<4x8xf32>
    %41 = vector.shape_cast %40 : vector<4x8xf32> to vector<4x8x1xf32>
    %42 = vector.broadcast %41 : vector<4x8x1xf32> to vector<4x8x8xf32>
    %43 = arith.divf %39, %42 : vector<4x8x8xf32>
    %44 = arith.truncf %43 : vector<4x8x8xf32> to vector<4x8x8xbf16>
    %45 = arith.truncf %26 : vector<4x8x8xf32> to vector<4x8x8xbf16>
    "tpu.trace_start"() <{level = 10 : i32, message = "hqk,hkd->hqd"}> : () -> ()
    %cst_28 = arith.constant dense<0.000000e+00> : vector<4x8x8xf32>
    %46 = tpu.matmul %44, %45, %cst_28 {dimension_numbers = #tpu.dot_dimension_numbers<[2], [1], [1], [2], [0, 0, 0, 1, 1, 2], [0], [0]>} : vector<4x8x8xbf16>, vector<4x8x8xbf16>, vector<4x8x8xf32> -> vector<4x8x8xf32>
    "tpu.trace_stop"() : () -> ()
    %c0_29 = arith.constant 0 : index
    %c0_30 = arith.constant 0 : index
    %c0_31 = arith.constant 0 : index
    %c0_32 = arith.constant 0 : index
    %47 = vector.load %arg7[%c0_29, %c0_30, %c0_31, %c0_32] : memref<2x4x8x32xf32, #tpu.memory_space<vmem>>, vector<1x4x8x32xf32>
    %48 = vector.shape_cast %47 : vector<1x4x8x32xf32> to vector<4x8x32xf32>
    %49 = arith.truncf %46 : vector<4x8x8xf32> to vector<4x8x8xbf16>
    %50 = arith.truncf %48 : vector<4x8x32xf32> to vector<4x8x32xbf16>
    "tpu.trace_start"() <{level = 10 : i32, message = "hqd,hdo->hqo"}> : () -> ()
    %cst_33 = arith.constant dense<0.000000e+00> : vector<4x8x32xf32>
    %51 = tpu.matmul %49, %50, %cst_33 {dimension_numbers = #tpu.dot_dimension_numbers<[2], [1], [1], [2], [0, 0, 0, 1, 1, 2], [0], [0]>} : vector<4x8x8xbf16>, vector<4x8x32xbf16>, vector<4x8x32xf32> -> vector<4x8x32xf32>
    "tpu.trace_stop"() : () -> ()
    %cst_34 = arith.constant dense<0.000000e+00> : vector<8x32xf32>
    %52 = vector.multi_reduction <add>, %51, %cst_34 [0] : vector<4x8x32xf32> to vector<8x32xf32>
    %53 = arith.addf %52, %3 : vector<8x32xf32>
    %c0_35 = arith.constant 0 : index
    %c0_36 = arith.constant 0 : index
    %c0_37 = arith.constant 0 : index
    %54 = vector.load %arg8[%c0_35, %c0_36, %c0_37] : memref<2x1x32xf32, #tpu.memory_space<vmem>>, vector<1x1x32xf32>
    %55 = vector.shape_cast %54 : vector<1x1x32xf32> to vector<1x32xf32>
    %c0_38 = arith.constant 0 : index
    %c0_39 = arith.constant 0 : index
    %c0_40 = arith.constant 0 : index
    %56 = vector.load %arg9[%c0_38, %c0_39, %c0_40] : memref<2x1x32xf32, #tpu.memory_space<vmem>>, vector<1x1x32xf32>
    %57 = vector.shape_cast %56 : vector<1x1x32xf32> to vector<1x32xf32>
    %cst_41 = arith.constant dense<0.000000e+00> : vector<8xf32>
    %58 = vector.multi_reduction <add>, %53, %cst_41 [1] : vector<8x32xf32> to vector<8xf32>
    %59 = vector.shape_cast %58 : vector<8xf32> to vector<8x1xf32>
    %cst_42 = arith.constant 3.200000e+01 : f32
    %60 = vector.broadcast %cst_42 : f32 to vector<8x1xf32>
    %61 = arith.divf %59, %60 : vector<8x1xf32>
    %62 = vector.broadcast %61 : vector<8x1xf32> to vector<8x32xf32>
    %63 = arith.subf %53, %62 : vector<8x32xf32>
    %64 = arith.mulf %63, %63 : vector<8x32xf32>
    %cst_43 = arith.constant dense<0.000000e+00> : vector<8xf32>
    %65 = vector.multi_reduction <add>, %64, %cst_43 [1] : vector<8x32xf32> to vector<8xf32>
    %66 = vector.shape_cast %65 : vector<8xf32> to vector<8x1xf32>
    %cst_44 = arith.constant 3.200000e+01 : f32
    %67 = vector.broadcast %cst_44 : f32 to vector<8x1xf32>
    %68 = arith.divf %66, %67 : vector<8x1xf32>
    %69 = vector.broadcast %61 : vector<8x1xf32> to vector<8x32xf32>
    %70 = arith.subf %53, %69 : vector<8x32xf32>
    %cst_45 = arith.constant 9.99999997E-7 : f32
    %71 = vector.broadcast %cst_45 : f32 to vector<8x1xf32>
    %72 = arith.addf %68, %71 : vector<8x1xf32>
    %73 = math.rsqrt %72 : vector<8x1xf32>
    %74 = vector.broadcast %73 : vector<8x1xf32> to vector<8x32xf32>
    %75 = arith.mulf %70, %74 : vector<8x32xf32>
    %76 = vector.broadcast %55 : vector<1x32xf32> to vector<8x32xf32>
    %77 = arith.mulf %75, %76 : vector<8x32xf32>
    %78 = vector.broadcast %57 : vector<1x32xf32> to vector<8x32xf32>
    %79 = arith.addf %77, %78 : vector<8x32xf32>
    %c0_46 = arith.constant 0 : index
    %c0_47 = arith.constant 0 : index
    %c0_48 = arith.constant 0 : index
    %80 = vector.load %arg10[%c0_46, %c0_47, %c0_48] : memref<2x32x64xf32, #tpu.memory_space<vmem>>, vector<1x32x64xf32>
    %81 = vector.shape_cast %80 : vector<1x32x64xf32> to vector<32x64xf32>
    %82 = arith.truncf %79 : vector<8x32xf32> to vector<8x32xbf16>
    %83 = arith.truncf %81 : vector<32x64xf32> to vector<32x64xbf16>
    %cst_49 = arith.constant dense<0.000000e+00> : vector<8x64xf32>
    %84 = tpu.matmul %82, %83, %cst_49 {dimension_numbers = #tpu.dot_dimension_numbers<[1], [0], [0], [1], [0, 0, 1, 1], [], []>} : vector<8x32xbf16>, vector<32x64xbf16>, vector<8x64xf32> -> vector<8x64xf32>
    %c0_50 = arith.constant 0 : index
    %c0_51 = arith.constant 0 : index
    %c0_52 = arith.constant 0 : index
    %85 = vector.load %arg11[%c0_50, %c0_51, %c0_52] : memref<2x1x64xf32, #tpu.memory_space<vmem>>, vector<1x1x64xf32>
    %86 = vector.shape_cast %85 : vector<1x1x64xf32> to vector<1x64xf32>
    %87 = vector.broadcast %86 : vector<1x64xf32> to vector<8x64xf32>
    %88 = arith.addf %84, %87 : vector<8x64xf32>
    %cst_53 = arith.constant 0.000000e+00 : f32
    %89 = vector.broadcast %cst_53 : f32 to vector<8x64xf32>
    %90 = arith.maximumf %88, %89 : vector<8x64xf32>
    %c0_54 = arith.constant 0 : index
    %c0_55 = arith.constant 0 : index
    %c0_56 = arith.constant 0 : index
    %91 = vector.load %arg12[%c0_54, %c0_55, %c0_56] : memref<2x64x32xf32, #tpu.memory_space<vmem>>, vector<1x64x32xf32>
    %92 = vector.shape_cast %91 : vector<1x64x32xf32> to vector<64x32xf32>
    %93 = arith.truncf %90 : vector<8x64xf32> to vector<8x64xbf16>
    %94 = arith.truncf %92 : vector<64x32xf32> to vector<64x32xbf16>
    %cst_57 = arith.constant dense<0.000000e+00> : vector<8x32xf32>
    %95 = tpu.matmul %93, %94, %cst_57 {dimension_numbers = #tpu.dot_dimension_numbers<[1], [0], [0], [1], [0, 0, 1, 1], [], []>} : vector<8x64xbf16>, vector<64x32xbf16>, vector<8x32xf32> -> vector<8x32xf32>
    %c0_58 = arith.constant 0 : index
    %c0_59 = arith.constant 0 : index
    %c0_60 = arith.constant 0 : index
    %96 = vector.load %arg13[%c0_58, %c0_59, %c0_60] : memref<2x1x32xf32, #tpu.memory_space<vmem>>, vector<1x1x32xf32>
    %97 = vector.shape_cast %96 : vector<1x1x32xf32> to vector<1x32xf32>
    %98 = vector.broadcast %97 : vector<1x32xf32> to vector<8x32xf32>
    %99 = arith.addf %95, %98 : vector<8x32xf32>
    %100 = arith.addf %99, %79 : vector<8x32xf32>
    %c0_61 = arith.constant 0 : index
    %c0_62 = arith.constant 0 : index
    %c0_63 = arith.constant 0 : index
    %101 = vector.load %arg14[%c0_61, %c0_62, %c0_63] : memref<2x1x32xf32, #tpu.memory_space<vmem>>, vector<1x1x32xf32>
    %102 = vector.shape_cast %101 : vector<1x1x32xf32> to vector<1x32xf32>
    %c0_64 = arith.constant 0 : index
    %c0_65 = arith.constant 0 : index
    %c0_66 = arith.constant 0 : index
    %103 = vector.load %arg15[%c0_64, %c0_65, %c0_66] : memref<2x1x32xf32, #tpu.memory_space<vmem>>, vector<1x1x32xf32>
    %104 = vector.shape_cast %103 : vector<1x1x32xf32> to vector<1x32xf32>
    %cst_67 = arith.constant dense<0.000000e+00> : vector<8xf32>
    %105 = vector.multi_reduction <add>, %100, %cst_67 [1] : vector<8x32xf32> to vector<8xf32>
    %106 = vector.shape_cast %105 : vector<8xf32> to vector<8x1xf32>
    %cst_68 = arith.constant 3.200000e+01 : f32
    %107 = vector.broadcast %cst_68 : f32 to vector<8x1xf32>
    %108 = arith.divf %106, %107 : vector<8x1xf32>
    %109 = vector.broadcast %108 : vector<8x1xf32> to vector<8x32xf32>
    %110 = arith.subf %100, %109 : vector<8x32xf32>
    %111 = arith.mulf %110, %110 : vector<8x32xf32>
    %cst_69 = arith.constant dense<0.000000e+00> : vector<8xf32>
    %112 = vector.multi_reduction <add>, %111, %cst_69 [1] : vector<8x32xf32> to vector<8xf32>
    %113 = vector.shape_cast %112 : vector<8xf32> to vector<8x1xf32>
    %cst_70 = arith.constant 3.200000e+01 : f32
    %114 = vector.broadcast %cst_70 : f32 to vector<8x1xf32>
    %115 = arith.divf %113, %114 : vector<8x1xf32>
    %116 = vector.broadcast %108 : vector<8x1xf32> to vector<8x32xf32>
    %117 = arith.subf %100, %116 : vector<8x32xf32>
    %cst_71 = arith.constant 9.99999997E-7 : f32
    %118 = vector.broadcast %cst_71 : f32 to vector<8x1xf32>
    %119 = arith.addf %115, %118 : vector<8x1xf32>
    %120 = math.rsqrt %119 : vector<8x1xf32>
    %121 = vector.broadcast %120 : vector<8x1xf32> to vector<8x32xf32>
    %122 = arith.mulf %117, %121 : vector<8x32xf32>
    %123 = vector.broadcast %102 : vector<1x32xf32> to vector<8x32xf32>
    %124 = arith.mulf %122, %123 : vector<8x32xf32>
    %125 = vector.broadcast %104 : vector<1x32xf32> to vector<8x32xf32>
    %126 = arith.addf %124, %125 : vector<8x32xf32>
    %127 = arith.truncf %126 : vector<8x32xf32> to vector<8x32xbf16>
    %128 = vector.shape_cast %127 : vector<8x32xbf16> to vector<1x8x32xbf16>
    %129 = vector.shape_cast %128 : vector<1x8x32xbf16> to vector<1x8x32xbf16>
    %130 = vector.broadcast %129 : vector<1x8x32xbf16> to vector<4x8x32xbf16>
    %c1 = arith.constant 1 : index
    %c0_72 = arith.constant 0 : index
    %c0_73 = arith.constant 0 : index
    %c0_74 = arith.constant 0 : index
    %131 = vector.load %arg4[%c1, %c0_72, %c0_73, %c0_74] : memref<2x4x32x8xf32, #tpu.memory_space<vmem>>, vector<1x4x32x8xf32>
    %132 = vector.shape_cast %131 : vector<1x4x32x8xf32> to vector<4x32x8xf32>
    %133 = arith.truncf %132 : vector<4x32x8xf32> to vector<4x32x8xbf16>
    "tpu.trace_start"() <{level = 10 : i32, message = "hsd,hdk->hsk"}> : () -> ()
    %cst_75 = arith.constant dense<0.000000e+00> : vector<4x8x8xf32>
    %134 = tpu.matmul %130, %133, %cst_75 {dimension_numbers = #tpu.dot_dimension_numbers<[2], [1], [1], [2], [0, 0, 0, 1, 1, 2], [0], [0]>} : vector<4x8x32xbf16>, vector<4x32x8xbf16>, vector<4x8x8xf32> -> vector<4x8x8xf32>
    "tpu.trace_stop"() : () -> ()
    %c1_76 = arith.constant 1 : index
    %c0_77 = arith.constant 0 : index
    %c0_78 = arith.constant 0 : index
    %c0_79 = arith.constant 0 : index
    %135 = vector.load %arg5[%c1_76, %c0_77, %c0_78, %c0_79] : memref<2x4x32x8xf32, #tpu.memory_space<vmem>>, vector<1x4x32x8xf32>
    %136 = vector.shape_cast %135 : vector<1x4x32x8xf32> to vector<4x32x8xf32>
    %137 = arith.truncf %136 : vector<4x32x8xf32> to vector<4x32x8xbf16>
    "tpu.trace_start"() <{level = 10 : i32, message = "hsd,hdk->hsk"}> : () -> ()
    %cst_80 = arith.constant dense<0.000000e+00> : vector<4x8x8xf32>
    %138 = tpu.matmul %130, %137, %cst_80 {dimension_numbers = #tpu.dot_dimension_numbers<[2], [1], [1], [2], [0, 0, 0, 1, 1, 2], [0], [0]>} : vector<4x8x32xbf16>, vector<4x32x8xbf16>, vector<4x8x8xf32> -> vector<4x8x8xf32>
    "tpu.trace_stop"() : () -> ()
    %c1_81 = arith.constant 1 : index
    %c0_82 = arith.constant 0 : index
    %c0_83 = arith.constant 0 : index
    %c0_84 = arith.constant 0 : index
    %139 = vector.load %arg6[%c1_81, %c0_82, %c0_83, %c0_84] : memref<2x4x32x8xf32, #tpu.memory_space<vmem>>, vector<1x4x32x8xf32>
    %140 = vector.shape_cast %139 : vector<1x4x32x8xf32> to vector<4x32x8xf32>
    %141 = arith.truncf %140 : vector<4x32x8xf32> to vector<4x32x8xbf16>
    "tpu.trace_start"() <{level = 10 : i32, message = "hsd,hdk->hsk"}> : () -> ()
    %cst_85 = arith.constant dense<0.000000e+00> : vector<4x8x8xf32>
    %142 = tpu.matmul %130, %141, %cst_85 {dimension_numbers = #tpu.dot_dimension_numbers<[2], [1], [1], [2], [0, 0, 0, 1, 1, 2], [0], [0]>} : vector<4x8x32xbf16>, vector<4x32x8xbf16>, vector<4x8x8xf32> -> vector<4x8x8xf32>
    "tpu.trace_stop"() : () -> ()
    %cst_86 = arith.constant 0.353553385 : f32
    %143 = vector.broadcast %cst_86 : f32 to vector<4x8x8xf32>
    %144 = arith.mulf %134, %143 : vector<4x8x8xf32>
    %145 = arith.truncf %144 : vector<4x8x8xf32> to vector<4x8x8xbf16>
    %146 = arith.truncf %138 : vector<4x8x8xf32> to vector<4x8x8xbf16>
    "tpu.trace_start"() <{level = 10 : i32, message = "hqd,hkd->hqk"}> : () -> ()
    %cst_87 = arith.constant dense<0.000000e+00> : vector<4x8x8xf32>
    %147 = tpu.matmul %145, %146, %cst_87 {dimension_numbers = #tpu.dot_dimension_numbers<[2], [2], [1], [1], [0, 0, 0, 1, 1, 1], [0], [0]>} : vector<4x8x8xbf16>, vector<4x8x8xbf16>, vector<4x8x8xf32> -> vector<4x8x8xf32>
    "tpu.trace_stop"() : () -> ()
    %148 = vector.shape_cast %10 : vector<1x8xf32> to vector<1x1x8xf32>
    %149 = vector.broadcast %148 : vector<1x1x8xf32> to vector<4x8x8xf32>
    %150 = arith.addf %147, %149 : vector<4x8x8xf32>
    %cst_88 = arith.constant dense<0xFF800000> : vector<4x8xf32>
    %151 = vector.multi_reduction <maximumf>, %150, %cst_88 [2] : vector<4x8x8xf32> to vector<4x8xf32>
    %152 = vector.shape_cast %151 : vector<4x8xf32> to vector<4x8x1xf32>
    %153 = vector.broadcast %152 : vector<4x8x1xf32> to vector<4x8x8xf32>
    %154 = arith.subf %150, %153 : vector<4x8x8xf32>
    %155 = math.exp %154 : vector<4x8x8xf32>
    %cst_89 = arith.constant dense<0.000000e+00> : vector<4x8xf32>
    %156 = vector.multi_reduction <add>, %155, %cst_89 [2] : vector<4x8x8xf32> to vector<4x8xf32>
    %157 = vector.shape_cast %156 : vector<4x8xf32> to vector<4x8x1xf32>
    %158 = vector.broadcast %157 : vector<4x8x1xf32> to vector<4x8x8xf32>
    %159 = arith.divf %155, %158 : vector<4x8x8xf32>
    %160 = arith.truncf %159 : vector<4x8x8xf32> to vector<4x8x8xbf16>
    %161 = arith.truncf %142 : vector<4x8x8xf32> to vector<4x8x8xbf16>
    "tpu.trace_start"() <{level = 10 : i32, message = "hqk,hkd->hqd"}> : () -> ()
    %cst_90 = arith.constant dense<0.000000e+00> : vector<4x8x8xf32>
    %162 = tpu.matmul %160, %161, %cst_90 {dimension_numbers = #tpu.dot_dimension_numbers<[2], [1], [1], [2], [0, 0, 0, 1, 1, 2], [0], [0]>} : vector<4x8x8xbf16>, vector<4x8x8xbf16>, vector<4x8x8xf32> -> vector<4x8x8xf32>
    "tpu.trace_stop"() : () -> ()
    %c1_91 = arith.constant 1 : index
    %c0_92 = arith.constant 0 : index
    %c0_93 = arith.constant 0 : index
    %c0_94 = arith.constant 0 : index
    %163 = vector.load %arg7[%c1_91, %c0_92, %c0_93, %c0_94] : memref<2x4x8x32xf32, #tpu.memory_space<vmem>>, vector<1x4x8x32xf32>
    %164 = vector.shape_cast %163 : vector<1x4x8x32xf32> to vector<4x8x32xf32>
    %165 = arith.truncf %162 : vector<4x8x8xf32> to vector<4x8x8xbf16>
    %166 = arith.truncf %164 : vector<4x8x32xf32> to vector<4x8x32xbf16>
    "tpu.trace_start"() <{level = 10 : i32, message = "hqd,hdo->hqo"}> : () -> ()
    %cst_95 = arith.constant dense<0.000000e+00> : vector<4x8x32xf32>
    %167 = tpu.matmul %165, %166, %cst_95 {dimension_numbers = #tpu.dot_dimension_numbers<[2], [1], [1], [2], [0, 0, 0, 1, 1, 2], [0], [0]>} : vector<4x8x8xbf16>, vector<4x8x32xbf16>, vector<4x8x32xf32> -> vector<4x8x32xf32>
    "tpu.trace_stop"() : () -> ()
    %cst_96 = arith.constant dense<0.000000e+00> : vector<8x32xf32>
    %168 = vector.multi_reduction <add>, %167, %cst_96 [0] : vector<4x8x32xf32> to vector<8x32xf32>
    %169 = arith.addf %168, %126 : vector<8x32xf32>
    %c1_97 = arith.constant 1 : index
    %c0_98 = arith.constant 0 : index
    %c0_99 = arith.constant 0 : index
    %170 = vector.load %arg8[%c1_97, %c0_98, %c0_99] : memref<2x1x32xf32, #tpu.memory_space<vmem>>, vector<1x1x32xf32>
    %171 = vector.shape_cast %170 : vector<1x1x32xf32> to vector<1x32xf32>
    %c1_100 = arith.constant 1 : index
    %c0_101 = arith.constant 0 : index
    %c0_102 = arith.constant 0 : index
    %172 = vector.load %arg9[%c1_100, %c0_101, %c0_102] : memref<2x1x32xf32, #tpu.memory_space<vmem>>, vector<1x1x32xf32>
    %173 = vector.shape_cast %172 : vector<1x1x32xf32> to vector<1x32xf32>
    %cst_103 = arith.constant dense<0.000000e+00> : vector<8xf32>
    %174 = vector.multi_reduction <add>, %169, %cst_103 [1] : vector<8x32xf32> to vector<8xf32>
    %175 = vector.shape_cast %174 : vector<8xf32> to vector<8x1xf32>
    %cst_104 = arith.constant 3.200000e+01 : f32
    %176 = vector.broadcast %cst_104 : f32 to vector<8x1xf32>
    %177 = arith.divf %175, %176 : vector<8x1xf32>
    %178 = vector.broadcast %177 : vector<8x1xf32> to vector<8x32xf32>
    %179 = arith.subf %169, %178 : vector<8x32xf32>
    %180 = arith.mulf %179, %179 : vector<8x32xf32>
    %cst_105 = arith.constant dense<0.000000e+00> : vector<8xf32>
    %181 = vector.multi_reduction <add>, %180, %cst_105 [1] : vector<8x32xf32> to vector<8xf32>
    %182 = vector.shape_cast %181 : vector<8xf32> to vector<8x1xf32>
    %cst_106 = arith.constant 3.200000e+01 : f32
    %183 = vector.broadcast %cst_106 : f32 to vector<8x1xf32>
    %184 = arith.divf %182, %183 : vector<8x1xf32>
    %185 = vector.broadcast %177 : vector<8x1xf32> to vector<8x32xf32>
    %186 = arith.subf %169, %185 : vector<8x32xf32>
    %cst_107 = arith.constant 9.99999997E-7 : f32
    %187 = vector.broadcast %cst_107 : f32 to vector<8x1xf32>
    %188 = arith.addf %184, %187 : vector<8x1xf32>
    %189 = math.rsqrt %188 : vector<8x1xf32>
    %190 = vector.broadcast %189 : vector<8x1xf32> to vector<8x32xf32>
    %191 = arith.mulf %186, %190 : vector<8x32xf32>
    %192 = vector.broadcast %171 : vector<1x32xf32> to vector<8x32xf32>
    %193 = arith.mulf %191, %192 : vector<8x32xf32>
    %194 = vector.broadcast %173 : vector<1x32xf32> to vector<8x32xf32>
    %195 = arith.addf %193, %194 : vector<8x32xf32>
    %c1_108 = arith.constant 1 : index
    %c0_109 = arith.constant 0 : index
    %c0_110 = arith.constant 0 : index
    %196 = vector.load %arg10[%c1_108, %c0_109, %c0_110] : memref<2x32x64xf32, #tpu.memory_space<vmem>>, vector<1x32x64xf32>
    %197 = vector.shape_cast %196 : vector<1x32x64xf32> to vector<32x64xf32>
    %198 = arith.truncf %195 : vector<8x32xf32> to vector<8x32xbf16>
    %199 = arith.truncf %197 : vector<32x64xf32> to vector<32x64xbf16>
    %cst_111 = arith.constant dense<0.000000e+00> : vector<8x64xf32>
    %200 = tpu.matmul %198, %199, %cst_111 {dimension_numbers = #tpu.dot_dimension_numbers<[1], [0], [0], [1], [0, 0, 1, 1], [], []>} : vector<8x32xbf16>, vector<32x64xbf16>, vector<8x64xf32> -> vector<8x64xf32>
    %c1_112 = arith.constant 1 : index
    %c0_113 = arith.constant 0 : index
    %c0_114 = arith.constant 0 : index
    %201 = vector.load %arg11[%c1_112, %c0_113, %c0_114] : memref<2x1x64xf32, #tpu.memory_space<vmem>>, vector<1x1x64xf32>
    %202 = vector.shape_cast %201 : vector<1x1x64xf32> to vector<1x64xf32>
    %203 = vector.broadcast %202 : vector<1x64xf32> to vector<8x64xf32>
    %204 = arith.addf %200, %203 : vector<8x64xf32>
    %cst_115 = arith.constant 0.000000e+00 : f32
    %205 = vector.broadcast %cst_115 : f32 to vector<8x64xf32>
    %206 = arith.maximumf %204, %205 : vector<8x64xf32>
    %c1_116 = arith.constant 1 : index
    %c0_117 = arith.constant 0 : index
    %c0_118 = arith.constant 0 : index
    %207 = vector.load %arg12[%c1_116, %c0_117, %c0_118] : memref<2x64x32xf32, #tpu.memory_space<vmem>>, vector<1x64x32xf32>
    %208 = vector.shape_cast %207 : vector<1x64x32xf32> to vector<64x32xf32>
    %209 = arith.truncf %206 : vector<8x64xf32> to vector<8x64xbf16>
    %210 = arith.truncf %208 : vector<64x32xf32> to vector<64x32xbf16>
    %cst_119 = arith.constant dense<0.000000e+00> : vector<8x32xf32>
    %211 = tpu.matmul %209, %210, %cst_119 {dimension_numbers = #tpu.dot_dimension_numbers<[1], [0], [0], [1], [0, 0, 1, 1], [], []>} : vector<8x64xbf16>, vector<64x32xbf16>, vector<8x32xf32> -> vector<8x32xf32>
    %c1_120 = arith.constant 1 : index
    %c0_121 = arith.constant 0 : index
    %c0_122 = arith.constant 0 : index
    %212 = vector.load %arg13[%c1_120, %c0_121, %c0_122] : memref<2x1x32xf32, #tpu.memory_space<vmem>>, vector<1x1x32xf32>
    %213 = vector.shape_cast %212 : vector<1x1x32xf32> to vector<1x32xf32>
    %214 = vector.broadcast %213 : vector<1x32xf32> to vector<8x32xf32>
    %215 = arith.addf %211, %214 : vector<8x32xf32>
    %216 = arith.addf %215, %195 : vector<8x32xf32>
    %c1_123 = arith.constant 1 : index
    %c0_124 = arith.constant 0 : index
    %c0_125 = arith.constant 0 : index
    %217 = vector.load %arg14[%c1_123, %c0_124, %c0_125] : memref<2x1x32xf32, #tpu.memory_space<vmem>>, vector<1x1x32xf32>
    %218 = vector.shape_cast %217 : vector<1x1x32xf32> to vector<1x32xf32>
    %c1_126 = arith.constant 1 : index
    %c0_127 = arith.constant 0 : index
    %c0_128 = arith.constant 0 : index
    %219 = vector.load %arg15[%c1_126, %c0_127, %c0_128] : memref<2x1x32xf32, #tpu.memory_space<vmem>>, vector<1x1x32xf32>
    %220 = vector.shape_cast %219 : vector<1x1x32xf32> to vector<1x32xf32>
    %cst_129 = arith.constant dense<0.000000e+00> : vector<8xf32>
    %221 = vector.multi_reduction <add>, %216, %cst_129 [1] : vector<8x32xf32> to vector<8xf32>
    %222 = vector.shape_cast %221 : vector<8xf32> to vector<8x1xf32>
    %cst_130 = arith.constant 3.200000e+01 : f32
    %223 = vector.broadcast %cst_130 : f32 to vector<8x1xf32>
    %224 = arith.divf %222, %223 : vector<8x1xf32>
    %225 = vector.broadcast %224 : vector<8x1xf32> to vector<8x32xf32>
    %226 = arith.subf %216, %225 : vector<8x32xf32>
    %227 = arith.mulf %226, %226 : vector<8x32xf32>
    %cst_131 = arith.constant dense<0.000000e+00> : vector<8xf32>
    %228 = vector.multi_reduction <add>, %227, %cst_131 [1] : vector<8x32xf32> to vector<8xf32>
    %229 = vector.shape_cast %228 : vector<8xf32> to vector<8x1xf32>
    %cst_132 = arith.constant 3.200000e+01 : f32
    %230 = vector.broadcast %cst_132 : f32 to vector<8x1xf32>
    %231 = arith.divf %229, %230 : vector<8x1xf32>
    %232 = vector.broadcast %224 : vector<8x1xf32> to vector<8x32xf32>
    %233 = arith.subf %216, %232 : vector<8x32xf32>
    %cst_133 = arith.constant 9.99999997E-7 : f32
    %234 = vector.broadcast %cst_133 : f32 to vector<8x1xf32>
    %235 = arith.addf %231, %234 : vector<8x1xf32>
    %236 = math.rsqrt %235 : vector<8x1xf32>
    %237 = vector.broadcast %236 : vector<8x1xf32> to vector<8x32xf32>
    %238 = arith.mulf %233, %237 : vector<8x32xf32>
    %239 = vector.broadcast %218 : vector<1x32xf32> to vector<8x32xf32>
    %240 = arith.mulf %238, %239 : vector<8x32xf32>
    %241 = vector.broadcast %220 : vector<1x32xf32> to vector<8x32xf32>
    %242 = arith.addf %240, %241 : vector<8x32xf32>
    %c0_134 = arith.constant 0 : index
    %c0_135 = arith.constant 0 : index
    %243 = vector.load %arg16[%c0_134, %c0_135] : memref<1x32xf32, #tpu.memory_space<vmem>>, vector<1x32xf32>
    %c0_136 = arith.constant 0 : index
    %c0_137 = arith.constant 0 : index
    %244 = vector.load %arg17[%c0_136, %c0_137] : memref<1x32xf32, #tpu.memory_space<vmem>>, vector<1x32xf32>
    %cst_138 = arith.constant dense<0.000000e+00> : vector<8xf32>
    %245 = vector.multi_reduction <add>, %242, %cst_138 [1] : vector<8x32xf32> to vector<8xf32>
    %246 = vector.shape_cast %245 : vector<8xf32> to vector<8x1xf32>
    %cst_139 = arith.constant 3.200000e+01 : f32
    %247 = vector.broadcast %cst_139 : f32 to vector<8x1xf32>
    %248 = arith.divf %246, %247 : vector<8x1xf32>
    %249 = vector.broadcast %248 : vector<8x1xf32> to vector<8x32xf32>
    %250 = arith.subf %242, %249 : vector<8x32xf32>
    %251 = arith.mulf %250, %250 : vector<8x32xf32>
    %cst_140 = arith.constant dense<0.000000e+00> : vector<8xf32>
    %252 = vector.multi_reduction <add>, %251, %cst_140 [1] : vector<8x32xf32> to vector<8xf32>
    %253 = vector.shape_cast %252 : vector<8xf32> to vector<8x1xf32>
    %cst_141 = arith.constant 3.200000e+01 : f32
    %254 = vector.broadcast %cst_141 : f32 to vector<8x1xf32>
    %255 = arith.divf %253, %254 : vector<8x1xf32>
    %256 = vector.broadcast %248 : vector<8x1xf32> to vector<8x32xf32>
    %257 = arith.subf %242, %256 : vector<8x32xf32>
    %cst_142 = arith.constant 9.99999997E-7 : f32
    %258 = vector.broadcast %cst_142 : f32 to vector<8x1xf32>
    %259 = arith.addf %255, %258 : vector<8x1xf32>
    %260 = math.rsqrt %259 : vector<8x1xf32>
    %261 = vector.broadcast %260 : vector<8x1xf32> to vector<8x32xf32>
    %262 = arith.mulf %257, %261 : vector<8x32xf32>
    %263 = vector.broadcast %243 : vector<1x32xf32> to vector<8x32xf32>
    %264 = arith.mulf %262, %263 : vector<8x32xf32>
    %265 = vector.broadcast %244 : vector<1x32xf32> to vector<8x32xf32>
    %266 = arith.addf %264, %265 : vector<8x32xf32>
    %c0_143 = arith.constant 0 : index
    %c0_144 = arith.constant 0 : index
    %c0_145 = arith.constant 0 : index
    %267 = vector.load %arg18[%c0_143, %c0_144, %c0_145] : memref<1x8x32xf32, #tpu.memory_space<vmem>>, vector<1x8x32xf32>
    %268 = vector.shape_cast %267 : vector<1x8x32xf32> to vector<8x32xf32>
    %269 = vector.shape_cast %266 : vector<8x32xf32> to vector<1x8x32xf32>
    tpu.vector_store %arg18[%c0_143, %c0_144, %c0_145], %269 {strides = array<i32>} : memref<1x8x32xf32, #tpu.memory_space<vmem>>, vector<1x8x32xf32>,
    return
  }
  func.func @transform_0(%arg0: i32) -> (i32, i32, i32) {
    %c0_i32 = arith.constant 0 : i32
    %c0_i32_0 = arith.constant 0 : i32
    %c0_i32_1 = arith.constant 0 : i32
    return %arg0, %c0_i32, %c0_i32_0 : i32, i32, i32
  }
  func.func @transform_1(%arg0: i32) -> (i32, i32) {
    %c0_i32 = arith.constant 0 : i32
    %c0_i32_0 = arith.constant 0 : i32
    %c0_i32_1 = arith.constant 0 : i32
    return %c0_i32, %c0_i32_0 : i32, i32
  }
  func.func @transform_2(%arg0: i32) -> (i32, i32, i32) {
    %c0_i32 = arith.constant 0 : i32
    %c0_i32_0 = arith.constant 0 : i32
    %c0_i32_1 = arith.constant 0 : i32
    return %arg0, %c0_i32, %c0_i32_0 : i32, i32, i32
  }
  func.func @transform_3(%arg0: i32) -> (i32, i32, i32, i32) {
    %c0_i32 = arith.constant 0 : i32
    %c0_i32_0 = arith.constant 0 : i32
    %c0_i32_1 = arith.constant 0 : i32
    %c0_i32_2 = arith.constant 0 : i32
    %c0_i32_3 = arith.constant 0 : i32
    return %c0_i32, %c0_i32_0, %c0_i32_1, %c0_i32_2 : i32, i32, i32, i32
  }
  func.func @transform_4(%arg0: i32) -> (i32, i32, i32, i32) {
    %c0_i32 = arith.constant 0 : i32
    %c0_i32_0 = arith.constant 0 : i32
    %c0_i32_1 = arith.constant 0 : i32
    %c0_i32_2 = arith.constant 0 : i32
    %c0_i32_3 = arith.constant 0 : i32
    return %c0_i32, %c0_i32_0, %c0_i32_1, %c0_i32_2 : i32, i32, i32, i32
  }
  func.func @transform_5(%arg0: i32) -> (i32, i32, i32, i32) {
    %c0_i32 = arith.constant 0 : i32
    %c0_i32_0 = arith.constant 0 : i32
    %c0_i32_1 = arith.constant 0 : i32
    %c0_i32_2 = arith.constant 0 : i32
    %c0_i32_3 = arith.constant 0 : i32
    return %c0_i32, %c0_i32_0, %c0_i32_1, %c0_i32_2 : i32, i32, i32, i32
  }
  func.func @transform_6(%arg0: i32) -> (i32, i32, i32, i32) {
    %c0_i32 = arith.constant 0 : i32
    %c0_i32_0 = arith.constant 0 : i32
    %c0_i32_1 = arith.constant 0 : i32
    %c0_i32_2 = arith.constant 0 : i32
    %c0_i32_3 = arith.constant 0 : i32
    return %c0_i32, %c0_i32_0, %c0_i32_1, %c0_i32_2 : i32, i32, i32, i32
  }
  func.func @transform_7(%arg0: i32) -> (i32, i32, i32) {
    %c0_i32 = arith.constant 0 : i32
    %c0_i32_0 = arith.constant 0 : i32
    %c0_i32_1 = arith.constant 0 : i32
    %c0_i32_2 = arith.constant 0 : i32
    return %c0_i32, %c0_i32_0, %c0_i32_1 : i32, i32, i32
  }
  func.func @transform_8(%arg0: i32) -> (i32, i32, i32) {
    %c0_i32 = arith.constant 0 : i32
    %c0_i32_0 = arith.constant 0 : i32
    %c0_i32_1 = arith.constant 0 : i32
    %c0_i32_2 = arith.constant 0 : i32
    return %c0_i32, %c0_i32_0, %c0_i32_1 : i32, i32, i32
  }
  func.func @transform_9(%arg0: i32) -> (i32, i32, i32) {
    %c0_i32 = arith.constant 0 : i32
    %c0_i32_0 = arith.constant 0 : i32
    %c0_i32_1 = arith.constant 0 : i32
    %c0_i32_2 = arith.constant 0 : i32
    return %c0_i32, %c0_i32_0, %c0_i32_1 : i32, i32, i32
  }
  func.func @transform_10(%arg0: i32) -> (i32, i32, i32) {
    %c0_i32 = arith.constant 0 : i32
    %c0_i32_0 = arith.constant 0 : i32
    %c0_i32_1 = arith.constant 0 : i32
    %c0_i32_2 = arith.constant 0 : i32
    return %c0_i32, %c0_i32_0, %c0_i32_1 : i32, i32, i32
  }
  func.func @transform_11(%arg0: i32) -> (i32, i32, i32) {
    %c0_i32 = arith.constant 0 : i32
    %c0_i32_0 = arith.constant 0 : i32
    %c0_i32_1 = arith.constant 0 : i32
    %c0_i32_2 = arith.constant 0 : i32
    return %c0_i32, %c0_i32_0, %c0_i32_1 : i32, i32, i32
  }
  func.func @transform_12(%arg0: i32) -> (i32, i32, i32) {
    %c0_i32 = arith.constant 0 : i32
    %c0_i32_0 = arith.constant 0 : i32
    %c0_i32_1 = arith.constant 0 : i32
    %c0_i32_2 = arith.constant 0 : i32
    return %c0_i32, %c0_i32_0, %c0_i32_1 : i32, i32, i32
  }
  func.func @transform_13(%arg0: i32) -> (i32, i32, i32) {
    %c0_i32 = arith.constant 0 : i32
    %c0_i32_0 = arith.constant 0 : i32
    %c0_i32_1 = arith.constant 0 : i32
    %c0_i32_2 = arith.constant 0 : i32
    return %c0_i32, %c0_i32_0, %c0_i32_1 : i32, i32, i32
  }
  func.func @transform_14(%arg0: i32) -> (i32, i32, i32) {
    %c0_i32 = arith.constant 0 : i32
    %c0_i32_0 = arith.constant 0 : i32
    %c0_i32_1 = arith.constant 0 : i32
    %c0_i32_2 = arith.constant 0 : i32
    return %c0_i32, %c0_i32_0, %c0_i32_1 : i32, i32, i32
  }
  func.func @transform_15(%arg0: i32) -> (i32, i32) {
    %c0_i32 = arith.constant 0 : i32
    %c0_i32_0 = arith.constant 0 : i32
    %c0_i32_1 = arith.constant 0 : i32
    return %c0_i32, %c0_i32_0 : i32, i32
  }
  func.func @transform_16(%arg0: i32) -> (i32, i32) {
    %c0_i32 = arith.constant 0 : i32
    %c0_i32_0 = arith.constant 0 : i32
    %c0_i32_1 = arith.constant 0 : i32
    return %c0_i32, %c0_i32_0 : i32, i32
  }
  func.func @transform_17(%arg0: i32) -> (i32, i32, i32) {
    %c0_i32 = arith.constant 0 : i32
    %c0_i32_0 = arith.constant 0 : i32
    %c0_i32_1 = arith.constant 0 : i32
    return %arg0, %c0_i32, %c0_i32_0 : i32, i32, i32
  }
}

</mosaic_0001>

<bundles_post_ra>
// kernel: tpu_custom_call.1
= control target key start
LH: loop header
LB: loop body
LE: loop exit
PB: predicated region body
PF: predicated region fallthrough
CT: control target
= control target key end

     0   :  { %s5244_s0 = inlined_call_operand.vmem [shape: f32[2,8,32], index: 0, kind: input, shape index: {}]   ;;  %s5245_s1 = inlined_call_operand.vmem [shape: f32[8,32], index: 1, kind: input, shape index: {}]   ;;  %s5246_s2 = inlined_call_operand.vmem [shape: f32[2,1,8], index: 2, kind: input, shape index: {}]   ;;  %s5247_s3 = inlined_call_operand.vmem [shape: f32[2,4,32,8], index: 3, kind: input, shape index: {}]   ;;  %s5248_s4 = inlined_call_operand.vmem [shape: f32[2,4,32,8], index: 4, kind: input, shape index: {}]   ;;  %s5249_s5 = inlined_call_operand.vmem [shape: f32[2,4,32,8], index: 5, kind: input, shape index: {}]   ;;  %s5250_s6 = inlined_call_operand.vmem [shape: f32[2,4,8,32], index: 6, kind: input, shape index: {}]   ;;  %s5251_s7 = inlined_call_operand.vmem [shape: f32[2,1,32], index: 7, kind: input, shape index: {}]   ;;  %s5252_s8 = inlined_call_operand.vmem [shape: f32[2,1,32], index: 8, kind: input, shape index: {}]   ;;  %s5253_s9 = inlined_call_operand.vmem [shape: f32[2,32,64], index: 9, kind: input, shape index: {}]   ;;  %s5254_s10 = inlined_call_operand.vmem [shape: f32[2,1,64], index: 10, kind: input, shape index: {}]   ;;  %s5255_s11 = inlined_call_operand.vmem [shape: f32[2,64,32], index: 11, kind: input, shape index: {}]   ;;  %s5256_s12 = inlined_call_operand.vmem [shape: f32[2,1,32], index: 12, kind: input, shape index: {}]   ;;  %s5257_s13 = inlined_call_operand.vmem [shape: f32[2,1,32], index: 13, kind: input, shape index: {}]   ;;  %s5258_s14 = inlined_call_operand.vmem [shape: f32[2,1,32], index: 14, kind: input, shape index: {}]   ;;  %s5259_s15 = inlined_call_operand.vmem [shape: f32[1,32], index: 15, kind: input, shape index: {}]   ;;  %s5260_s16 = inlined_call_operand.vmem [shape: f32[1,32], index: 16, kind: input, shape index: {}]   ;;  %s5261_s17 = inlined_call_operand.hbm [shape: f32[2,8,32], index: 17, kind: output, shape index: {}]  }
   0x1   :  { %5269 = sst [smem:[#allocation11_spill]] %s5244_s0 }
   0x2   :  { %5270 = sst [smem:[#allocation12_spill]] %s5245_s1 }
   0x3   :  { %5271 = sst [smem:[#allocation13_spill]] %s5259_s15 }
   0x4   :  { %5272 = sst [smem:[#allocation14_spill]] %s5260_s16 }
   0x5   :  { %5273 = sst [smem:[#allocation15_spill]] %s5261_s17 }
   0x6   :  { %22 = vsyncpa [#allocation3], 0 }
   0x7   :  { %24 = vsyncpa [#allocation3 + $0x1], 0  ;;  %s4342_s24 = smov 0   ;;  %s4344_s25 = smov 0  }
   0x8   :  { %s4346_s26 = smov 0   ;;  %s4348_s27 = smov 0  }
   0x9 LB: > { %5274 = sst [smem:[#allocation5_spill]] %s4235_s24  ;;  %s4363_s28 = sadd.s32 4294967295, %s4247_s27   ;;  %s4247_s27 = sphi %s4348_s27, %s5290_s27   ;;  %s4243_s26 = sphi %s4346_s26, %s5292_s26   ;;  %s4239_s25 = sphi %s4344_s25, %s5294_s25   ;;  %s4235_s24 = sphi %s4342_s24, %s5293_s24  }
   0xa   : > { %5275 = sst [smem:[#allocation6_spill]] %s4243_s26  ;;  %s3444_s29 = sadd.s32 4294967294, %s4247_s27  }
   0xb   : > { %5276 = sst [smem:[#allocation7_spill]] %s4247_s27  ;;  %s4367_s0 = sadd.s32 1, %s4247_s27  }
   0xc   : > { %5277 = sst [smem:[#allocation8_spill]] %s4367_s0  ;;  %s404_s30 = sadd.s32 1, %s4243_s26 }
   0xd   : > { %s401_s18 = ssub.s32 %s4247_s27, %s4367_s0  ;;  %p414_p0 = scmp.ne.s32.totalorder %s4243_s26, %s4239_s25 }
   0xe   : > { %p402_p1 = scmp.eq.s32.totalorder %s401_s18, 0  ;;  %p415_p2 = scmp.eq.s32.totalorder %s4363_s28, 1 }
   0xf   : > { %p420_p3 = scmp.ne.s32.totalorder %s4239_s25, %s4235_s24  ;;  %p421_p4 = scmp.eq.s32.totalorder %s3444_s29, 1 }
  0x10   : > { %s4378_s19 = scalar_select %p402_p1, %s4243_s26, %s404_s30  }
  0x11   : > { %p4380_p5 = por %p415_p2, %p414_p0  ;;  %p4384_p6 = por %p421_p4, %p420_p3 }
  0x12   : > { %5278 = sst [smem:[#allocation9_spill]] %s4378_s19  ;;  %p3447_p7 = scmp.ge.s32.totalorder %s4247_s27, 1 }
  0x13   : > { %s5280_s20 = scalar_select %p4384_p6, 1, 0 }
  0x14   : > { %p497_p8 = scmp.lt.s32.totalorder %s4247_s27, 3 }
  0x15   : > { %5281 = sst [smem:[#allocation10_spill]] %s5280_s20 }
  0x16   : > { %p498_p9 = pnand %p3447_p7, %p497_p8 }
  0x17   : > { %v566_v0 = vld [vmem:[%s5247_s3] sm:$0xff] (!%p498_p9)  ;;  %v567_v1 = vld [vmem:[%s5247_s3 + $0x8] sm:$0xff] (!%p498_p9)  ;;  %p551_p10 = scmp.lt.s32.totalorder (!%p498_p9), %s4363_s28, 1  ;;  %v4249_v3 = vmov (!%p498_p9), 0.0   ;;  %v568_v6 = vld [vmem:[%s5247_s3 + $0x10] sm:$0xff] (!%p498_p9)  ;;  %vm4250_vm0 = vmmov (!%p498_p9), 0  }
  0x18   : > { %501 = sbr.rel (%p498_p9) target bundleno = 4923 (0x133b), region = 88  ;;  %v574_v2 = vld [vmem:[%s5247_s3 + $0x40] sm:$0xff] (!%p498_p9)  ;;  %3726 = vmatprep.subr.bf16.mxu1 (!%p498_p9), %v4249_v3  ;;  %3742 = vmatprep.subr.bf16.mxu0 (!%p498_p9), %v4249_v3  ;;  %v582_v4 = vpack.c.bf16 (!%p498_p9), %v567_v1, %v566_v0  ;;  %v575_v5 = vld [vmem:[%s5247_s3 + $0x48] sm:$0xff] (!%p498_p9)  ;;  %v569_v7 = vld [vmem:[%s5247_s3 + $0x18] sm:$0xff] (!%p498_p9)  ;;  %s5282_s21 = sld [smem:[#allocation12_spill]] (!%p498_p9)  ;;  %vm590_vm1 = vcmask (!%p498_p9), 261120  }
  0x19   : > { %v586_v8 = vpack.c.bf16 (!%p498_p9), %v575_v5, %v574_v2  ;;  %v576_v9 = vld [vmem:[%s5247_s3 + $0x50] sm:$0xff] (!%p498_p9)  ;;  %v577_v10 = vld [vmem:[%s5247_s3 + $0x58] sm:$0xff] (!%p498_p9)  ;;  %3730 = vmatprep.mubr.msk.bf16.mxu1 (!%p498_p9), %vm4250_vm0, %v4249_v3  ;;  %3746 = vmatprep.mubr.msk.bf16.mxu0 (!%p498_p9), %vm4250_vm0, %v4249_v3  ;;  %v583_v11 = vpack.c.bf16 (!%p498_p9), %v569_v7, %v568_v6  ;;  %v570_v14 = vld [vmem:[%s5247_s3 + $0x20] sm:$0xff] (!%p498_p9)  ;;  %s5283_s18 = sld [smem:[#allocation11_spill]] (!%p498_p9)  ;;  %vm1140_vm2 = vcmask (!%p498_p9), 64512   ;;  %vm1380_vm3 = vcmask (!%p498_p9), 1043456  }
  0x1a   : > { %3727 = vmatpush3.bf16.msra.mxu1 (!%p498_p9), %v582_v4  ;;  %v587_v12 = vpack.c.bf16 (!%p498_p9), %v577_v10, %v576_v9  ;;  %v571_v15 = vld [vmem:[%s5247_s3 + $0x28] sm:$0xff] (!%p498_p9)  ;;  %v754_v16 = vld [vmem:[%s5248_s4] sm:$0xff] (!%p498_p9)  ;;  %v572_v22 = vld [vmem:[%s5247_s3 + $0x30] sm:$0xff] (!%p498_p9)  ;;  %vm1874_vm5 = vcmask (!%p498_p9), 523264   ;;  %s548_s23 = sand.u32 (!%p498_p9), 1, %s4239_s25   ;;  %s5284_s0 = sld [smem:[#allocation13_spill]] (!%p498_p9) }
  0x1b   : > { %3743 = vmatpush3.bf16.msra.mxu0 (!%p498_p9), %v586_v8  ;;  %3728 = vmatprep.subr.bf16.mxu1 (!%p498_p9), %v4249_v3  ;;  %v755_v17 = vld [vmem:[%s5248_s4 + $0x8] sm:$0xff] (!%p498_p9)  ;;  %v584_v20 = vpack.c.bf16 (!%p498_p9), %v571_v15, %v570_v14  ;;  %v573_v24 = vld [vmem:[%s5247_s3 + $0x38] sm:$0xff] (!%p498_p9)  ;;  %v756_v25 = vld [vmem:[%s5248_s4 + $0x10] sm:$0xff] (!%p498_p9)  ;;  %s3448_s29 = sshll.u32 (!%p498_p9), %s548_s23, 3  ;;  %s5285_s27 = sld [smem:[#allocation14_spill]] (!%p498_p9) }
  0x1c   : > { %3744 = vmatprep.subr.bf16.mxu0 (!%p498_p9), %v4249_v3  ;;  %v770_v21 = vpack.c.bf16 (!%p498_p9), %v755_v17, %v754_v16  ;;  %v757_v26 = vld [vmem:[%s5248_s4 + $0x18] sm:$0xff] (!%p498_p9)  ;;  %v585_v27 = vpack.c.bf16 (!%p498_p9), %v573_v24, %v572_v22  ;;  %v578_v29 = vld [vmem:[%s5247_s3 + $0x60] sm:$0xff] (!%p498_p9)  ;;  %v579_v30 = vld [vmem:[%s5247_s3 + $0x68] sm:$0xff] (!%p498_p9)  ;;  %s3587_s15 = sshll.u32 (!%p498_p9), %s4363_s28, 7  ;;  %s550_s16 = scalar_lea.vmem (!%p498_p9), [#allocation2], %s3448_s29 }
  0x1d   : > { %v771_v28 = vpack.c.bf16 (!%p498_p9), %v757_v26, %v756_v25  ;;  %v762_v31 = vld [vmem:[%s5248_s4 + $0x40] sm:$0xff] (!%p498_p9)  ;;  %v763_v32 = vld [vmem:[%s5248_s4 + $0x48] sm:$0xff] (!%p498_p9)  ;;  %v588_v33 = vpack.c.bf16 (!%p498_p9), %v579_v30, %v578_v29  ;;  %v580_v35 = vld [vmem:[%s5247_s3 + $0x70] sm:$0xff] (!%p498_p9)  ;;  %s3363_s30 = scalar_lea.sflag (!%p498_p9), [#allocation3], %s548_s23 }
  0x1e   : > { %v560_v13 = vld [vmem:[%s5282_s21] sm:$0xff] (!%p498_p9)  ;;  %3729 = vmatpush3.bf16.msra.mxu1 (!%p498_p9), %v583_v11  ;;  %v774_v34 = vpack.c.bf16 (!%p498_p9), %v763_v32, %v762_v31  ;;  %v581_v36 = vld [vmem:[%s5247_s3 + $0x78] sm:$0xff] (!%p498_p9)  ;;  %v764_v37 = vld [vmem:[%s5248_s4 + $0x50] sm:$0xff] (!%p498_p9)  ;;  %s5286_s21 = sld [smem:[#allocation15_spill]] (!%p498_p9) }
  0x1f   : > { %s4424_s19 = scalar_select %p551_p10, %s4363_s28, 1  ;;  %3745 = vmatpush3.bf16.msra.mxu0 %v587_v12  ;;  %3734 = vmatprep.subr.bf16.mxu1 %v4249_v3  ;;  %v765_v38 = vld [vmem:[%s5248_s4 + $0x58] sm:$0xff]  ;;  %v589_v39 = vpack.c.bf16 %v581_v36, %v580_v35  ;;  %v758_v41 = vld [vmem:[%s5248_s4 + $0x20] sm:$0xff]  ;;  %v759_v42 = vld [vmem:[%s5248_s4 + $0x28] sm:$0xff] }
  0x20   : > { %3758 = vmatprep.subr.bf16.mxu0 %v4249_v3  ;;  %v775_v40 = vpack.c.bf16 %v765_v38, %v764_v37  ;;  %v938_v43 = vld [vmem:[%s5249_s5] sm:$0xff]  ;;  %v939_v44 = vld [vmem:[%s5249_s5 + $0x8] sm:$0xff]  ;;  %v772_v45 = vpack.c.bf16 %v759_v42, %v758_v41  ;;  %v760_v46 = vld [vmem:[%s5248_s4 + $0x30] sm:$0xff]  ;;  %s4251_s28 = smov [#allocation2]  }
  0x21   : > { %s3449_s26 = sshll.u32 %s4424_s19, 3  ;;  %v761_v47 = vld [vmem:[%s5248_s4 + $0x38] sm:$0xff]  ;;  %v954_v48 = vpack.c.bf16 %v939_v44, %v938_v43  ;;  %v940_v49 = vld [vmem:[%s5249_s5 + $0x10] sm:$0xff]  ;;  %v766_v52 = vld [vmem:[%s5248_s4 + $0x60] sm:$0xff]  ;;  %s4189_s29 = sshll.u32 %s4251_s28, 4  ;;  %s4190_s29 = int_to_ptr.vmem [resolvable:$false] %s4189_s29 }
  0x22   : > { %s554_s24 = scalar_lea.vmem %s5283_s18, %s3449_s26  ;;  %v941_v50 = vld [vmem:[%s5249_s5 + $0x18] sm:$0xff]  ;;  %v773_v51 = vpack.c.bf16 %v761_v47, %v760_v46  ;;  %v767_v53 = vld [vmem:[%s5248_s4 + $0x68] sm:$0xff]  ;;  %v946_v55 = vld [vmem:[%s5249_s5 + $0x40] sm:$0xff] }
  0x23   : > { %v559_v18 = vld [vmem:[%s554_s24] sm:$0xff]  ;;  %v955_v54 = vpack.c.bf16 %v941_v50, %v940_v49  ;;  %v947_v56 = vld [vmem:[%s5249_s5 + $0x48] sm:$0xff]  ;;  %v776_v57 = vpack.c.bf16 %v767_v53, %v766_v52  ;;  %v768_v58 = vld [vmem:[%s5248_s4 + $0x70] sm:$0xff]  ;;  %s557_s24 = scalar_lea.vmem %s5246_s2, %s4424_s19 }
  0x24   : > { %v4447_v19 = vadd.f32 %v560_v13, %v559_v18  ;;  %v769_v59 = vld [vmem:[%s5248_s4 + $0x78] sm:$0xff]  ;;  %v958_v60 = vpack.c.bf16 %v947_v56, %v946_v55  ;;  %v948_v62 = vld [vmem:[%s5249_s5 + $0x50] sm:$0xff]  ;;  %v942_v1 = vld [vmem:[%s5249_s5 + $0x20] sm:$0xff]  ;;  %s5201_s22 = scalar_lea.hbm %s5286_s21, %s3587_s15 }
  0x25   : > { %v777_v61 = vpack.c.bf16 %v769_v59, %v768_v58  ;;  %v949_v63 = vld [vmem:[%s5249_s5 + $0x58] sm:$0xff]  ;;  %v943_v2 = vld [vmem:[%s5249_s5 + $0x28] sm:$0xff]  ;;  %v944_v5 = vld [vmem:[%s5249_s5 + $0x30] sm:$0xff] }
  0x26   : > { %v4455_v23 = vpack.c.bf16 %v4447_v19, %v4447_v19  ;;  %v959_v0 = vpack.c.bf16 %v949_v63, %v948_v62  ;;  %v956_v4 = vpack.c.bf16 %v943_v2, %v942_v1  ;;  %v945_v6 = vld [vmem:[%s5249_s5 + $0x38] sm:$0xff]  ;;  %v950_v8 = vld [vmem:[%s5249_s5 + $0x60] sm:$0xff]  ;;  %v951_v9 = vld [vmem:[%s5249_s5 + $0x68] sm:$0xff] }
  0x27   : > { %v957_v7 = vpack.c.bf16 %v945_v6, %v944_v5  ;;  %v960_v10 = vpack.c.bf16 %v951_v9, %v950_v8  ;;  %v952_v11 = vld [vmem:[%s5249_s5 + $0x70] sm:$0xff]  ;;  %v953_v12 = vld [vmem:[%s5249_s5 + $0x78] sm:$0xff] }
  0x28   : > { %3731 = vmatmul.mubr.msk.bf16.vlgmr.msra.gmra.mrb[0].mxu1 %vm590_vm1, %v4455_v23  ;;  %3747 = vmatmul.mubr.msk.bf16.vlgmr.msra.gmra.mrb[0].mxu0 %vm590_vm1, %v4455_v23  ;;  %v961_v13 = vpack.c.bf16 %v953_v12, %v952_v11 }
  0x29   : > { %3735 = vmatpush3.bf16.msra.mxu1 %v584_v20  ;;  %3759 = vmatpush3.bf16.msra.mxu0 %v770_v21 }
  0x2a   : > { %3736 = vmatprep.subr.bf16.mxu1 %v4249_v3  ;;  %3760 = vmatprep.subr.bf16.mxu0 %v4249_v3 }
  0x2b   : > { %3738 = vmatprep.mubr.msk.bf16.mxu1 %vm4250_vm0, %v4249_v3  ;;  %3762 = vmatprep.mubr.msk.bf16.mxu0 %vm4250_vm0, %v4249_v3 }
  0x2d   : > { %3737 = vmatpush3.bf16.msra.mxu1 %v585_v27  ;;  %3761 = vmatpush3.bf16.msra.mxu0 %v771_v28 }
  0x2e   : > { %3750 = vmatprep.subr.bf16.mxu1 %v4249_v3  ;;  %3774 = vmatprep.subr.bf16.mxu0 %v4249_v3 }
  0x30   : > { %3739 = vmatmul.mubr.msk.bf16.vlgmr.msra.gmra.mrb[4].mxu1 %vm590_vm1, %v4455_v23  ;;  %3763 = vmatmul.mubr.msk.bf16.vlgmr.msra.gmra.mrb[4].mxu0 %vm590_vm1, %v4455_v23 }
  0x31   : > { %3751 = vmatpush3.bf16.msra.mxu1 %v588_v33  ;;  %3775 = vmatpush3.bf16.msra.mxu0 %v774_v34 }
  0x32   : > { %3752 = vmatprep.subr.bf16.mxu1 %v4249_v3  ;;  %3776 = vmatprep.subr.bf16.mxu0 %v4249_v3 }
  0x33   : > { %3754 = vmatprep.mubr.msk.bf16.mxu1 %vm4250_vm0, %v4249_v3  ;;  %3778 = vmatprep.mubr.msk.bf16.mxu0 %vm4250_vm0, %v4249_v3 }
  0x35   : > { %3753 = vmatpush3.bf16.msra.mxu1 %v589_v39  ;;  %3777 = vmatpush3.bf16.msra.mxu0 %v775_v40 }
  0x36   : > { %3766 = vmatprep.subr.bf16.mxu1 %v4249_v3  ;;  %3790 = vmatprep.subr.bf16.mxu0 %v4249_v3 }
  0x38   : > { %3755 = vmatmul.mubr.msk.bf16.vlgmr.msra.gmra.mrb[8].mxu1 %vm590_vm1, %v4455_v23  ;;  %3779 = vmatmul.mubr.msk.bf16.vlgmr.msra.gmra.mrb[8].mxu0 %vm590_vm1, %v4455_v23 }
  0x39   : > { %3767 = vmatpush3.bf16.msra.mxu1 %v772_v45  ;;  %3770 = vmatprep.mubr.msk.bf16.mxu1 %vm4250_vm0, %v4249_v3 }
  0x3a   : > { %3768 = vmatprep.subr.bf16.mxu1 %v4249_v3  ;;  %3791 = vmatpush3.bf16.msra.mxu0 %v954_v48 }
  0x3b   : > { %3792 = vmatprep.subr.bf16.mxu0 %v4249_v3  ;;  %3794 = vmatprep.mubr.msk.bf16.mxu0 %vm4250_vm0, %v4249_v3 }
  0x3d   : > { %3769 = vmatpush3.bf16.msra.mxu1 %v773_v51 }
  0x3e   : > { %3782 = vmatprep.subr.bf16.mxu1 %v4249_v3  ;;  %3793 = vmatpush3.bf16.msra.mxu0 %v955_v54 }
  0x3f   : > { %3806 = vmatprep.subr.bf16.mxu0 %v4249_v3 }
  0x40   : > { %3771 = vmatmul.mubr.msk.bf16.vlgmr.msra.gmra.mrb[12].mxu1 %vm590_vm1, %v4455_v23 }
  0x41   : > { %3783 = vmatpush3.bf16.msra.mxu1 %v776_v57  ;;  %3786 = vmatprep.mubr.msk.bf16.mxu1 %vm4250_vm0, %v4249_v3 }
  0x42   : > { %3784 = vmatprep.subr.bf16.mxu1 %v4249_v3  ;;  %3795 = vmatmul.mubr.msk.bf16.vlgmr.msra.gmra.mrb[12].mxu0 %vm590_vm1, %v4455_v23 }
  0x43   : > { %3807 = vmatpush3.bf16.msra.mxu0 %v958_v60  ;;  %3810 = vmatprep.mubr.msk.bf16.mxu0 %vm4250_vm0, %v4249_v3 }
  0x44   : > { %3808 = vmatprep.subr.bf16.mxu0 %v4249_v3 }
  0x45   : > { %3785 = vmatpush3.bf16.msra.mxu1 %v777_v61 }
  0x46   : > { %3798 = vmatprep.subr.bf16.mxu1 %v4249_v3 }
  0x47   : > { %3809 = vmatpush3.bf16.msra.mxu0 %v959_v0 }
  0x48   : > { %3787 = vmatmul.mubr.msk.bf16.vlgmr.msra.gmra.mrb[16].mxu1 %vm590_vm1, %v4455_v23  ;;  %3822 = vmatprep.subr.bf16.mxu0 %v4249_v3 }
  0x49   : > { %3802 = vmatprep.mubr.msk.bf16.mxu1 %vm4250_vm0, %v4249_v3  ;;  %3799 = vmatpush3.bf16.msra.mxu1 %v956_v4 }
  0x4a   : > { %3800 = vmatprep.subr.bf16.mxu1 %v4249_v3  ;;  %3811 = vmatmul.mubr.msk.bf16.vlgmr.msra.gmra.mrb[16].mxu0 %vm590_vm1, %v4455_v23 }
  0x4b   : > { %3824 = vmatprep.mubr.msk.bf16.mxu0 %vm4250_vm0, %v4249_v3 }
  0x4d   : > { %3801 = vmatpush3.bf16.msra.mxu1 %v957_v7 }
  0x4e   : > { %3814 = vmatprep.subr.bf16.mxu1 %v4249_v3 }
  0x50   : > { %3803 = vmatmul.mubr.msk.bf16.vlgmr.msra.gmra.mrb[20].mxu1 %vm590_vm1, %v4455_v23 }
  0x51   : > { %3818 = vmatprep.mubr.msk.bf16.mxu1 %vm4250_vm0, %v4249_v3  ;;  %3815 = vmatpush3.bf16.msra.mxu1 %v960_v10 }
  0x52   : > { %3816 = vmatprep.subr.bf16.mxu1 %v4249_v3 }
  0x55   : > { %3817 = vmatpush3.bf16.msra.mxu1 %v961_v13 }
  0x56   : > { %3828 = vmatprep.subr.bf16.mxu1 %v4249_v3 }
  0x58   : > { %3819 = vmatmul.mubr.msk.bf16.vlgmr.msra.gmra.mrb[24].mxu1 %vm590_vm1, %v4455_v23 }
  0x59   : > { %3830 = vmatprep.mubr.msk.bf16.mxu1 %vm4250_vm0, %v4249_v3 }
  0xfb   : > { %v628_v14 = vpop.f32.mrb[0].mxu1  ;;  %v708_v15 = vpop.f32.mrb[0].mxu0 }
  0xfc   : > { %v3732_v16 = vpop.f32.mrb[1].mxu1  ;;  %v3748_v17 = vpop.f32.mrb[1].mxu0  ;;  %v1122_v33 = vmul.f32 0.35355338, %v628_v14  ;;  %v1124_v45 = vmul.f32 0.35355338, %v708_v15 }
  0xfd   : > { %v631_v18 = vpop.f32.mrb[2].mxu1  ;;  %v711_v20 = vpop.f32.mrb[2].mxu0 }
  0xfe   : > { %v3733_v21 = vpop.f32.mrb[3].mxu1  ;;  %v3749_v22 = vpop.f32.mrb[3].mxu0  ;;  %v1126_v36 = vpack.c.bf16 %v1122_v33, %v1122_v33  ;;  %v1128_v47 = vpack.c.bf16 %v1124_v45, %v1124_v45 }
  0xff   : > { %v1135_v21 = vlaneseq  ;;  %v562_v22 = vld [vmem:[%s557_s24] sm:$0x1]  ;;  %s3376_s24 = sshll.u32 %s550_s16, 4  ;;  %s5203_s24 = int_to_ptr.vmem [resolvable:$true] %s3376_s24 }
 0x100   : > { %vm563_vm4 = vcmp.eq.f32.partialorder %v562_v22, 0.0  ;;  %s4185_s18 = scalar_lea.vmem %s5203_s24, 128  ;;  %p4192_p0 = scmp.lt.s32.totalorder %s5203_s24, %s4190_s29 }
 0x101   : > { %p4186_p11 = scmp.ne.s32.totalorder %s5203_s24, %s4185_s18 }
 0x103   : > { %v668_v24 = vpop.f32.mrb[4].mxu1  ;;  %v812_v25 = vpop.f32.mrb[4].mxu0  ;;  %p4187_p12 = pnand %p4186_p11, %p4380_p5 }
 0x104   : > { %v1130_v26 = vpack.c.bf16 %v812_v25, %v812_v25  ;;  %v3740_v27 = vpop.f32.mrb[5].mxu1  ;;  %v3764_v28 = vpop.f32.mrb[5].mxu0  ;;  %v1123_v57 = vmul.f32 0.35355338, %v668_v24  ;;  %v1136_v24 = vshrl.u32 %v1135_v21, 7 }
 0x105   : > { %v671_v29 = vpop.f32.mrb[6].mxu1  ;;  %v815_v30 = vpop.f32.mrb[6].mxu0  ;;  %p4188_p13 = pneg %p4187_p12 }
 0x106   : > { %v1145_v23 = vsel %vm1140_vm2, %v1130_v26, 0  ;;  %v3741_v31 = vpop.f32.mrb[7].mxu1  ;;  %v3765_v32 = vpop.f32.mrb[7].mxu0  ;;  %v1127_v61 = vpack.c.bf16 %v1123_v57, %v1123_v57  ;;  %v1137_v25 = vsub.s32 0, %v1136_v24  ;;  %v564_v26 = vsel %vm563_vm4, -1e+09, %v4249_v3 }
 0x107   : > { %3823 = vmatpush3.bf16.xpose.msra.mxu0 %v1145_v23 }
 0x108   : > { %3834 = vmatprep.subr.bf16.mxu0 %v4249_v3  ;;  %v4664_v27 = vrot.slane %v564_v26, %v1137_v25 }
 0x10b   : > { %v748_v34 = vpop.f32.mrb[8].mxu1  ;;  %v892_v35 = vpop.f32.mrb[8].mxu0 }
 0x10c   : > { %v1132_v37 = vpack.c.bf16 %v892_v35, %v892_v35  ;;  %v3756_v38 = vpop.f32.mrb[9].mxu1  ;;  %v3780_v39 = vpop.f32.mrb[9].mxu0  ;;  %v1125_v4 = vmul.f32 0.35355338, %v748_v34 }
 0x10d   : > { %v751_v40 = vpop.f32.mrb[10].mxu1  ;;  %v895_v41 = vpop.f32.mrb[10].mxu0 }
 0x10e   : > { %v1237_v42 = vsel %vm1140_vm2, %v1132_v37, 0  ;;  %v3757_v43 = vpop.f32.mrb[11].mxu1  ;;  %3825 = vmatmul.mubr.msk.bf16.vlgmr.msra.gmra.mrb[20].mxu0 %vm1140_vm2, %v1126_v36  ;;  %v3781_v44 = vpop.f32.mrb[11].mxu0  ;;  %v1129_v5 = vpack.c.bf16 %v1125_v4, %v1125_v4 }
 0x10f   : > { %3835 = vmatpush3.bf16.xpose.msra.mxu0 %v1237_v42  ;;  %3836 = vmatprep.mubr.msk.bf16.mxu0 %vm4250_vm0, %v4249_v3 }
 0x110   : > { %3846 = vmatprep.subr.bf16.mxu0 %v4249_v3 }
 0x113   : > { %v852_v46 = vpop.f32.mrb[12].mxu1 }
 0x114   : > { %v1131_v48 = vpack.c.bf16 %v852_v46, %v852_v46  ;;  %v3772_v49 = vpop.f32.mrb[13].mxu1 }
 0x115   : > { %v855_v50 = vpop.f32.mrb[14].mxu1  ;;  %v996_v51 = vpop.f32.mrb[12].mxu0 }
 0x116   : > { %v1191_v52 = vsel %vm1140_vm2, %v1131_v48, 0  ;;  %v3773_v53 = vpop.f32.mrb[15].mxu1  ;;  %3837 = vmatmul.mubr.msk.bf16.vlgmr.msra.gmra.mrb[24].mxu0 %vm1140_vm2, %v1128_v47  ;;  %v1373_v54 = vpack.c.bf16 %v996_v51, %v996_v51  ;;  %v3796_v55 = vpop.f32.mrb[13].mxu0 }
 0x117   : > { %3829 = vmatpush3.bf16.xpose.msra.mxu1 %v1191_v52  ;;  %v999_v56 = vpop.f32.mrb[14].mxu0  ;;  %3848 = vmatprep.mubr.msk.bf16.mxu0 %vm4250_vm0, %v4249_v3 }
 0x118   : > { %3840 = vmatprep.subr.bf16.mxu1 %v4249_v3  ;;  %v1382_v58 = vsel %vm1380_vm3, %v1373_v54, 0  ;;  %v3797_v59 = vpop.f32.mrb[15].mxu0 }
 0x119   : > { %3847 = vmatpush3.bf16.msra.mxu0 %v1382_v58 }
 0x11a   : > { %3858 = vmatprep.subr.bf16.mxu0 %v4249_v3 }
 0x11b   : > { %v932_v60 = vpop.f32.mrb[16].mxu1 }
 0x11c   : > { %v1133_v62 = vpack.c.bf16 %v932_v60, %v932_v60  ;;  %v3788_v63 = vpop.f32.mrb[17].mxu1 }
 0x11d   : > { %v935_v0 = vpop.f32.mrb[18].mxu1  ;;  %v4653_v6 = vpop.f32.mrb[16].mxu0 }
 0x11e   : > { %v1283_v1 = vsel %vm1140_vm2, %v1133_v62, 0  ;;  %v3789_v2 = vpop.f32.mrb[19].mxu1  ;;  %3831 = vmatmul.mubr.msk.bf16.vlgmr.msra.gmra.mrb[28].mxu1 %vm1140_vm2, %v1127_v61  ;;  %v3812_v7 = vpop.f32.mrb[17].mxu0 }
 0x11f   : > { %3841 = vmatpush3.bf16.xpose.msra.mxu1 %v1283_v1  ;;  %3842 = vmatprep.mubr.msk.bf16.mxu1 %vm4250_vm0, %v4249_v3  ;;  %v1079_v8 = vpop.f32.mrb[18].mxu0 }
 0x120   : > { %3852 = vmatprep.subr.bf16.mxu1 %v4249_v3  ;;  %v3813_v9 = vpop.f32.mrb[19].mxu0 }
 0x123   : > { %v1036_v10 = vpop.f32.mrb[20].mxu1 }
 0x124   : > { %v1374_v11 = vpack.c.bf16 %v1036_v10, %v1036_v10  ;;  %v3804_v12 = vpop.f32.mrb[21].mxu1 }
 0x125   : > { %v1039_v13 = vpop.f32.mrb[22].mxu1  ;;  %v1375_v12 = vpack.c.bf16 %v4653_v6, %v4653_v6 }
 0x126   : > { %3843 = vmatmul.mubr.msk.bf16.vlgmr.msra.gmra.mrb[32].mxu1 %vm1140_vm2, %v1129_v5  ;;  %v1428_v14 = vsel %vm1380_vm3, %v1374_v11, 0  ;;  %v3805_v15 = vpop.f32.mrb[23].mxu1 }
 0x127   : > { %3854 = vmatprep.mubr.msk.bf16.mxu1 %vm4250_vm0, %v4249_v3  ;;  %3853 = vmatpush3.bf16.msra.mxu1 %v1428_v14  ;;  %v1474_v15 = vsel %vm1380_vm3, %v1375_v12, 0 }
 0x128   : > { %3864 = vmatprep.subr.bf16.mxu1 %v4249_v3 }
 0x12b   : > { %v4657_v16 = vpop.f32.mrb[24].mxu1 }
 0x12c   : > { %v3820_v17 = vpop.f32.mrb[25].mxu1  ;;  %v1376_v24 = vpack.c.bf16 %v4657_v16, %v4657_v16  ;;  %v1562_v16 = vld [vmem:[%s5250_s6] sm:$0xff] }
 0x12d   : > { %v1119_v18 = vpop.f32.mrb[26].mxu1 }
 0x12e   : > { %v3821_v20 = vpop.f32.mrb[27].mxu1 }
 0x1e1   : > { %v1181_v28 = vpop.f32.mrb[20].mxu0 }
 0x1e2   : > { %v1182_v29 = vadd.f32 %v1181_v28, %v4664_v27  ;;  %v3826_v30 = vpop.f32.mrb[21].mxu0  ;;  %v1520_v28 = vsel %vm1380_vm3, %v1376_v24, 0 }
 0x1e3   : > { %v1184_v23 = vpop.f32.mrb[22].mxu0 }
 0x1e4   : > { %v3827_v31 = vpop.f32.mrb[23].mxu0  ;;  %v1325_v32 = vsel %vm1140_vm2, %v1182_v29, -inf }
 0x1e5   : > { %1326 = vmax.xlane.f32.xlu0 %v1325_v32  ;;  %v1570_v31 = vpack.c.bf16 %v1562_v16, %v1562_v16 }
 0x1e7   : > { %v1578_v32 = vsel %vm1380_vm3, %v1570_v31, 0  ;;  %v1796_v31 = vld [vmem:[%s5253_s9] sm:$0xff] }
 0x1e9   : > { %v1273_v33 = vpop.f32.mrb[24].mxu0 }
 0x1ea   : > { %v1274_v34 = vadd.f32 %v1273_v33, %v4664_v27  ;;  %v3838_v35 = vpop.f32.mrb[25].mxu0  ;;  %v1563_v33 = vld [vmem:[%s5250_s6 + $0x8] sm:$0xff] }
 0x1eb   : > { %v1276_v36 = vpop.f32.mrb[26].mxu0 }
 0x1ec   : > { %v3839_v37 = vpop.f32.mrb[27].mxu0  ;;  %v1331_v38 = vsel %vm1140_vm2, %v1274_v34, -inf  ;;  %v1564_v36 = vld [vmem:[%s5250_s6 + $0x10] sm:$0xff] }
 0x1ed   : > { %1332 = vmax.xlane.f32.xlu1 %v1331_v38  ;;  %v1572_v37 = vpack.c.bf16 %v1564_v36, %v1564_v36  ;;  %v1854_v36 = vld [vmem:[%s5255_s11] sm:$0xff] }
 0x1f1   : > { %v1227_v39 = vpop.f32.mrb[28].mxu1 }
 0x1f2   : > { %v1228_v40 = vadd.f32 %v1227_v39, %v4664_v27  ;;  %v3832_v41 = vpop.f32.mrb[29].mxu1 }
 0x1f3   : > { %v1230_v42 = vpop.f32.mrb[30].mxu1  ;;  %v1670_v41 = vsel %vm1380_vm3, %v1572_v37, 0  ;;  %v1855_v37 = vld [vmem:[%s5255_s11 + $0x8] sm:$0xff] }
 0x1f4   : > { %v3833_v43 = vpop.f32.mrb[31].mxu1  ;;  %v1328_v44 = vsel %vm1140_vm2, %v1228_v40, -inf }
 0x1f5   : > { %1329 = vmax.xlane.f32.xlu0 %v1328_v44 }
 0x1f9   : > { %v1319_v45 = vpop.f32.mrb[32].mxu1 }
 0x1fa   : > { %v1320_v46 = vadd.f32 %v1319_v45, %v4664_v27  ;;  %v3844_v47 = vpop.f32.mrb[33].mxu1 }
 0x1fb   : > { %v1322_v48 = vpop.f32.mrb[34].mxu1 }
 0x1fc   : > { %v3845_v49 = vpop.f32.mrb[35].mxu1  ;;  %v1334_v50 = vsel %vm1140_vm2, %v1320_v46, -inf  ;;  %v1565_v48 = vld [vmem:[%s5250_s6 + $0x18] sm:$0xff] }
 0x1fd   : > { %1335 = vmax.xlane.f32.xlu1 %v1334_v50  ;;  %v1573_v50 = vpack.c.bf16 %v1565_v48, %v1565_v48  ;;  %v3475_v48 = vld [vmem:[%s5252_s8] ss:$0 sm:$0xff] }
 0x272   : > { %v1327_v51 = vpop.xlane.xlu0 %1326 }
 0x273   : > { %v1337_v52 = vsub.f32 %v1182_v29, %v1327_v51 }
 0x275   : > { %v1341_v53 = vmul.f32 1.442695, %v1337_v52 }
 0x277   : > { %4143 = vpow2.f32 %v1341_v53 }
 0x27a   : > { %v1333_v54 = vpop.xlane.xlu1 %1332 }
 0x27b   : > { %v1339_v55 = vsub.f32 %v1274_v34, %v1333_v54  ;;  %v1571_v34 = vpack.c.bf16 %v1563_v33, %v1563_v33  ;;  %v1716_v54 = vsel %vm1380_vm3, %v1573_v50, 0 }
 0x27d   : > { %v1345_v56 = vmul.f32 1.442695, %v1339_v55  ;;  %v1624_v35 = vsel %vm1380_vm3, %v1571_v34, 0  ;;  %v1799_v34 = vld [vmem:[%s5253_s9 + $0x18] sm:$0xff] }
 0x27f   : > { %4145 = vpow2.f32 %v1345_v56 }
 0x281   : > { %v4144_v57 = vpop.eup %4143 }
 0x282   : > { %v1330_v58 = vpop.xlane.xlu0 %1329  ;;  %v1349_v59 = vsel %vm1140_vm2, %v4144_v57, 0.0 }
 0x283   : > { %v1338_v60 = vsub.f32 %v1228_v40, %v1330_v58  ;;  %1350 = vadd.xlane.f32.xlu0 %v1349_v59 }
 0x285   : > { %v1343_v61 = vmul.f32 1.442695, %v1338_v60 }
 0x287   : > { %4147 = vpow2.f32 %v1343_v61 }
 0x289   : > { %v4146_v62 = vpop.eup %4145 }
 0x28a   : > { %v1336_v63 = vpop.xlane.xlu1 %1335  ;;  %v1355_v0 = vsel %vm1140_vm2, %v4146_v62, 0.0 }
 0x28b   : > { %v1340_v1 = vsub.f32 %v1320_v46, %v1336_v63  ;;  %1356 = vadd.xlane.f32.xlu0 %v1355_v0 }
 0x28d   : > { %v1347_v2 = vmul.f32 1.442695, %v1340_v1 }
 0x28f   : > { %4149 = vpow2.f32 %v1347_v2 }
 0x291   : > { %v4148_v4 = vpop.eup %4147 }
 0x292   : > { %v1352_v5 = vsel %vm1140_vm2, %v4148_v4, 0.0 }
 0x293   : > { %1353 = vadd.xlane.f32.xlu1 %v1352_v5 }
 0x299   : > { %v4150_v7 = vpop.eup %4149 }
 0x29a   : > { %v1358_v8 = vsel %vm1140_vm2, %v4150_v7, 0.0 }
 0x29b   : > { %1359 = vadd.xlane.f32.xlu1 %v1358_v8 }
 0x310   : > { %v1351_v9 = vpop.xlane.xlu0 %1350 }
 0x311   : > { %4151 = vrcp.f32 %v1351_v9 }
 0x318   : > { %v1357_v10 = vpop.xlane.xlu0 %1356 }
 0x319   : > { %4153 = vrcp.f32 %v1357_v10 }
 0x31b   : > { %v4152_v11 = vpop.eup %4151 }
 0x31c   : > { %v1362_v13 = vmul.f32 %v4152_v11, %v4144_v57 }
 0x31e   : > { %v1369_v14 = vpack.c.bf16 %v1362_v13, %v1362_v13 }
 0x320   : > { %3849 = vmatmul.mubr.msk.bf16.vlgmr.msra.gmra.mrb[28].mxu0 %vm1140_vm2, %v1369_v14  ;;  %v1354_v17 = vpop.xlane.xlu1 %1353 }
 0x321   : > { %3859 = vmatpush3.bf16.msra.mxu0 %v1474_v15  ;;  %4155 = vrcp.f32 %v1354_v17  ;;  %3860 = vmatprep.mubr.msk.bf16.mxu0 %vm4250_vm0, %v4249_v3 }
 0x322   : > { %3870 = vmatprep.subr.bf16.mxu0 %v4249_v3 }
 0x323   : > { %v4154_v18 = vpop.eup %4153 }
 0x324   : > { %v1366_v20 = vmul.f32 %v4154_v18, %v4146_v62 }
 0x326   : > { %v1371_v21 = vpack.c.bf16 %v1366_v20, %v1366_v20 }
 0x328   : > { %3861 = vmatmul.mubr.msk.bf16.vlgmr.msra.gmra.mrb[32].mxu0 %vm1140_vm2, %v1371_v21  ;;  %v1360_v6 = vpop.xlane.xlu1 %1359 }
 0x329   : > { %4157 = vrcp.f32 %v1360_v6  ;;  %3872 = vmatprep.mubr.msk.bf16.mxu0 %vm4250_vm0, %v4249_v3  ;;  %3871 = vmatpush3.bf16.msra.mxu0 %v1578_v32  ;;  %v1797_v32 = vld [vmem:[%s5253_s9 + $0x8] sm:$0xff] }
 0x32a   : > { %3882 = vmatprep.subr.bf16.mxu0 %v4249_v3  ;;  %v1801_v33 = vpack.c.bf16 %v1797_v32, %v1796_v31 }
 0x32b   : > { %v4156_v22 = vpop.eup %4155 }
 0x32c   : > { %v1364_v25 = vmul.f32 %v4156_v22, %v4148_v4 }
 0x32e   : > { %v1370_v26 = vpack.c.bf16 %v1364_v25, %v1364_v25 }
 0x330   : > { %3855 = vmatmul.mubr.msk.bf16.vlgmr.msra.gmra.mrb[36].mxu1 %vm1140_vm2, %v1370_v26 }
 0x331   : > { %3865 = vmatpush3.bf16.msra.mxu1 %v1520_v28  ;;  %3866 = vmatprep.mubr.msk.bf16.mxu1 %vm4250_vm0, %v4249_v3 }
 0x332   : > { %3876 = vmatprep.subr.bf16.mxu1 %v4249_v3 }
 0x333   : > { %v4158_v29 = vpop.eup %4157 }
 0x334   : > { %v1368_v30 = vmul.f32 %v4158_v29, %v4150_v7 }
 0x336   : > { %v1372_v23 = vpack.c.bf16 %v1368_v30, %v1368_v30 }
 0x338   : > { %3867 = vmatmul.mubr.msk.bf16.vlgmr.msra.gmra.mrb[40].mxu1 %vm1140_vm2, %v1372_v23 }
 0x339   : > { %3878 = vmatprep.mubr.msk.bf16.mxu1 %vm4250_vm0, %v4249_v3  ;;  %3877 = vmatpush3.bf16.msra.mxu1 %v1624_v35 }
 0x33a   : > { %3888 = vmatprep.subr.bf16.mxu1 %v4249_v3 }
 0x3f3   : > { %v1418_v38 = vpop.f32.mrb[28].mxu0 }
 0x3f4   : > { %v1566_v39 = vpack.c.bf16 %v1418_v38, %v1418_v38  ;;  %v3850_v40 = vpop.f32.mrb[29].mxu0  ;;  %v1856_v38 = vld [vmem:[%s5255_s11 + $0x10] sm:$0xff] }
 0x3f5   : > { %v1421_v42 = vpop.f32.mrb[30].mxu0  ;;  %v1857_v40 = vld [vmem:[%s5255_s11 + $0x18] sm:$0xff] }
 0x3f6   : > { %v3851_v43 = vpop.f32.mrb[31].mxu0  ;;  %3873 = vmatmul.mubr.msk.bf16.vlgmr.msra.gmra.mrb[36].mxu0 %vm1140_vm2, %v1566_v39  ;;  %v1863_v39 = vpack.c.bf16 %v1855_v37, %v1854_v36  ;;  %v3486_v36 = vld [vmem:[%s5247_s3 + $0xa0] sm:$0xff] }
 0x3f7   : > { %3883 = vmatpush3.bf16.msra.mxu0 %v1670_v41  ;;  %3884 = vmatprep.mubr.msk.bf16.mxu0 %vm4250_vm0, %v4249_v3  ;;  %v1864_v41 = vpack.c.bf16 %v1857_v40, %v1856_v38  ;;  %v3487_v38 = vld [vmem:[%s5247_s3 + $0xa8] sm:$0xff] }
 0x3f8   : > { %3894 = vmatprep.subr.bf16.mxu0 %v4249_v3  ;;  %v3503_v40 = vld [vmem:[%s5248_s4 + $0x88] sm:$0xff] }
 0x3fb   : > { %v1510_v44 = vpop.f32.mrb[32].mxu0 }
 0x3fc   : > { %v1568_v45 = vpack.c.bf16 %v1510_v44, %v1510_v44  ;;  %v3862_v46 = vpop.f32.mrb[33].mxu0 }
 0x3fd   : > { %v1513_v47 = vpop.f32.mrb[34].mxu0  ;;  %v3474_v46 = vld [vmem:[%s5251_s7] ss:$0 sm:$0xff] }
 0x3fe   : > { %v3863_v49 = vpop.f32.mrb[35].mxu0  ;;  %3885 = vmatmul.mubr.msk.bf16.vlgmr.msra.gmra.mrb[40].mxu0 %vm1140_vm2, %v1568_v45 }
 0x3ff   : > { %3898 = vmatprep.mubr.msk.bf16.mxu0 %vm4250_vm0, %v4249_v3  ;;  %3895 = vmatpush3.bf16.msra.mxu0 %v1801_v33 }
 0x400   : > { %3896 = vmatprep.subr.bf16.mxu0 %v4249_v3 }
 0x403   : > { %v1464_v51 = vpop.f32.mrb[36].mxu1 }
 0x404   : > { %v1567_v52 = vpack.c.bf16 %v1464_v51, %v1464_v51  ;;  %v3856_v53 = vpop.f32.mrb[37].mxu1 }
 0x405   : > { %v1467_v55 = vpop.f32.mrb[38].mxu1  ;;  %v1859_v53 = vld [vmem:[%s5255_s11 + $0x28] sm:$0xff] }
 0x406   : > { %v3857_v56 = vpop.f32.mrb[39].mxu1  ;;  %3879 = vmatmul.mubr.msk.bf16.vlgmr.msra.gmra.mrb[44].mxu1 %vm1140_vm2, %v1567_v52  ;;  %v1858_v52 = vld [vmem:[%s5255_s11 + $0x20] sm:$0xff]  ;;  %v1860_v55 = vld [vmem:[%s5255_s11 + $0x30] sm:$0xff] }
 0x407   : > { %3889 = vmatpush3.bf16.msra.mxu1 %v1716_v54  ;;  %3890 = vmatprep.mubr.msk.bf16.mxu1 %vm4250_vm0, %v4249_v3  ;;  %v1865_v54 = vpack.c.bf16 %v1859_v53, %v1858_v52  ;;  %v1861_v56 = vld [vmem:[%s5255_s11 + $0x38] sm:$0xff]  ;;  %v3495_v52 = vld [vmem:[%s5247_s3 + $0xe8] sm:$0xff]  ;;  %v3510_v53 = vld [vmem:[%s5248_s4 + $0xc0] sm:$0xff] }
 0x408   : > { %3902 = vmatprep.subr.bf16.mxu1 %v4249_v3 }
 0x40b   : > { %v1556_v57 = vpop.f32.mrb[40].mxu1 }
 0x40c   : > { %v1569_v58 = vpack.c.bf16 %v1556_v57, %v1556_v57  ;;  %v3868_v59 = vpop.f32.mrb[41].mxu1  ;;  %v1866_v57 = vpack.c.bf16 %v1861_v56, %v1860_v55 }
 0x40d   : > { %v1559_v60 = vpop.f32.mrb[42].mxu1 }
 0x40e   : > { %v3869_v61 = vpop.f32.mrb[43].mxu1  ;;  %3891 = vmatmul.mubr.msk.bf16.vlgmr.msra.gmra.mrb[48].mxu1 %vm1140_vm2, %v1569_v58  ;;  %v3476_v58 = vld [vmem:[%s5254_s10] ss:$0 sm:$0xff] }
 0x40f   : > { %3910 = vmatprep.mubr.msk.bf16.mxu1 %vm4250_vm0, %v4249_v3  ;;  %3903 = vmatpush3.bf16.msra.mxu1 %v1863_v39  ;;  %v3502_v39 = vld [vmem:[%s5248_s4 + $0x80] sm:$0xff] }
 0x410   : > { %3904 = vmatprep.subr.bf16.mxu1 %v4249_v3 }
 0x413   : > { %3905 = vmatpush3.bf16.msra.mxu1 %v1864_v41 }
 0x414   : > { %3906 = vmatprep.subr.bf16.mxu1 %v4249_v3 }
 0x417   : > { %3907 = vmatpush3.bf16.msra.mxu1 %v1865_v54  ;;  %v3511_v54 = vld [vmem:[%s5248_s4 + $0xc8] sm:$0xff] }
 0x418   : > { %3908 = vmatprep.subr.bf16.mxu1 %v4249_v3  ;;  %v2158_v56 = vpack.c.bf16 %v3511_v54, %v3510_v53 }
 0x41b   : > { %3909 = vmatpush3.bf16.msra.mxu1 %v1866_v57  ;;  %v3496_v57 = vld [vmem:[%s5247_s3 + $0xf0] sm:$0xff] }
 0x41c   : > { %3930 = vmatprep.subr.bf16.mxu1 %v4249_v3 }
 0x4c9   : > { %v1614_v62 = vpop.f32.mrb[36].mxu0 }
 0x4ca   : > { %v3874_v63 = vpop.f32.mrb[37].mxu0  ;;  %v1758_v9 = vsel %vm590_vm1, %v1614_v62, 0.0 }
 0x4cb   : > { %v1617_v0 = vpop.f32.mrb[38].mxu0 }
 0x4cc   : > { %v3875_v1 = vpop.f32.mrb[39].mxu0 }
 0x4d1   : > { %v1706_v2 = vpop.f32.mrb[40].mxu0 }
 0x4d2   : > { %v3886_v4 = vpop.f32.mrb[41].mxu0  ;;  %v1761_v14 = vsel %vm590_vm1, %v1706_v2, 0.0  ;;  %v3478_v2 = vld [vmem:[%s5256_s12] ss:$0 sm:$0xff] }
 0x4d3   : > { %v1709_v5 = vpop.f32.mrb[42].mxu0 }
 0x4d4   : > { %v3887_v7 = vpop.f32.mrb[43].mxu0 }
 0x4d9   : > { %v1660_v8 = vpop.f32.mrb[44].mxu1 }
 0x4da   : > { %v1759_v10 = vsel %vm590_vm1, %v1660_v8, 0.0  ;;  %v3880_v11 = vpop.f32.mrb[45].mxu1 }
 0x4db   : > { %v1760_v12 = vadd.f32 %v1759_v10, %v1758_v9  ;;  %v1663_v13 = vpop.f32.mrb[46].mxu1 }
 0x4dc   : > { %v3881_v15 = vpop.f32.mrb[47].mxu1 }
 0x4dd   : > { %v1762_v17 = vadd.f32 %v1761_v14, %v1760_v12 }
 0x4e1   : > { %v1752_v18 = vpop.f32.mrb[48].mxu1 }
 0x4e2   : > { %v1763_v20 = vsel %vm590_vm1, %v1752_v18, 0.0  ;;  %v3892_v21 = vpop.f32.mrb[49].mxu1  ;;  %v3482_v18 = vld [vmem:[%s5247_s3 + $0x80] sm:$0xff] }
 0x4e3   : > { %v1764_v6 = vadd.f32 %v1763_v20, %v1762_v17  ;;  %v1755_v22 = vpop.f32.mrb[50].mxu1  ;;  %v3483_v20 = vld [vmem:[%s5247_s3 + $0x88] sm:$0xff]  ;;  %v3490_v21 = vld [vmem:[%s5247_s3 + $0xc0] sm:$0xff] }
 0x4e4   : > { %v3893_v24 = vpop.f32.mrb[51].mxu1  ;;  %v3491_v22 = vld [vmem:[%s5247_s3 + $0xc8] sm:$0xff] }
 0x4e5   : > { %v1765_v25 = vadd.f32 %v1764_v6, %v4447_v19  ;;  %v1798_v19 = vld [vmem:[%s5253_s9 + $0x10] sm:$0xff]  ;;  %v1966_v6 = vpack.c.bf16 %v3483_v20, %v3482_v18  ;;  %v1970_v24 = vpack.c.bf16 %v3491_v22, %v3490_v21 }
 0x4e6   : > { %v1802_v35 = vpack.c.bf16 %v1799_v34, %v1798_v19  ;;  %v3480_v19 = vld [vmem:[%s5257_s13] ss:$0 sm:$0xff]  ;;  %v3516_v21 = vld [vmem:[%s5248_s4 + $0xf0] sm:$0xff] }
 0x4e7   : > { %v1768_v26 = vsel %vm590_vm1, %v1765_v25, 0.0  ;;  %v3532_v22 = vld [vmem:[%s5249_s5 + $0xd0] sm:$0xff] }
 0x4e8   : > { %1769 = vadd.xlane.f32.xlu0 %v1768_v26  ;;  %3897 = vmatpush3.bf16.msra.mxu0 %v1802_v35  ;;  %v3485_v26 = vld [vmem:[%s5247_s3 + $0x98] sm:$0xff]  ;;  %v3481_v35 = vld [vmem:[%s5258_s14] ss:$0 sm:$0xff] }
 0x4e9   : > { %3914 = vmatprep.subr.bf16.mxu0 %v4249_v3 }
 0x575   : > { %v1770_v28 = vpop.xlane.xlu0 %1769 }
 0x576   : > { %v1772_v29 = vmul.f32 0.03125, %v1770_v28  ;;  %v3492_v28 = vld [vmem:[%s5247_s3 + $0xd0] sm:$0xff] }
 0x578   : > { %v1773_v30 = vsub.f32 %v1765_v25, %v1772_v29  ;;  %v3484_v25 = vld [vmem:[%s5247_s3 + $0x90] sm:$0xff] }
 0x579   : > { %v1967_v29 = vpack.c.bf16 %v3485_v26, %v3484_v25 }
 0x57a   : > { %v1774_v23 = vmul.f32 %v1773_v30, %v1773_v30 }
 0x57c   : > { %v1775_v16 = vsel %vm590_vm1, %v1774_v23, 0.0 }
 0x57d   : > { %1776 = vadd.xlane.f32.xlu1 %v1775_v16 }
 0x60a   : > { %v1777_v42 = vpop.xlane.xlu1 %1776 }
 0x60b   : > { %v1778_v43 = vmul.f32 0.03125, %v1777_v42  ;;  %v1968_v42 = vpack.c.bf16 %v3487_v38, %v3486_v36 }
 0x60d   : > { %v1779_v44 = vadd.f32 1e-06, %v1778_v43  ;;  %v2154_v43 = vpack.c.bf16 %v3503_v40, %v3502_v39 }
 0x60f   : > { %4159 = vrsqrt.f32 %v1779_v44  ;;  %v3488_v44 = vld [vmem:[%s5247_s3 + $0xb0] sm:$0xff] }
 0x619   : > { %v4160_v45 = vpop.eup %4159 }
 0x61a   : > { %v1781_v47 = vmul.f32 %v4160_v45, %v1773_v30  ;;  %v3493_v30 = vld [vmem:[%s5247_s3 + $0xd8] sm:$0xff] }
 0x61b   : > { %v1971_v23 = vpack.c.bf16 %v3493_v30, %v3492_v28  ;;  %v3526_v28 = vld [vmem:[%s5249_s5 + $0xa0] sm:$0xff] }
 0x61c   : > { %v1788_v49 = vmul.f32 %v3474_v46, %v1781_v47  ;;  %v3489_v46 = vld [vmem:[%s5247_s3 + $0xb8] sm:$0xff]  ;;  %v3504_v47 = vld [vmem:[%s5248_s4 + $0x90] sm:$0xff] }
 0x61e   : > { %v1795_v50 = vadd.f32 %v3475_v48, %v1788_v49  ;;  %v3505_v48 = vld [vmem:[%s5248_s4 + $0x98] sm:$0xff]  ;;  %v1969_v49 = vpack.c.bf16 %v3489_v46, %v3488_v44 }
 0x620   : > { %v1800_v51 = vpack.c.bf16 %v1795_v50, %v1795_v50 }
 0x622   : > { %3899 = vmatmul.mubr.msk.bf16.vlgmr.msra.gmra.mrb[44].mxu0 %vm590_vm1, %v1800_v51  ;;  %v3494_v51 = vld [vmem:[%s5247_s3 + $0xe0] sm:$0xff] }
 0x623   : > { %3918 = vmatprep.mubr.msk.bf16.mxu0 %vm4250_vm0, %v4249_v3  ;;  %3915 = vmatpush3.bf16.msra.mxu0 %v1966_v6  ;;  %v1972_v55 = vpack.c.bf16 %v3495_v52, %v3494_v51  ;;  %v3517_v6 = vld [vmem:[%s5248_s4 + $0xf8] sm:$0xff] }
 0x624   : > { %3916 = vmatprep.subr.bf16.mxu0 %v4249_v3  ;;  %v2161_v25 = vpack.c.bf16 %v3517_v6, %v3516_v21 }
 0x627   : > { %3917 = vmatpush3.bf16.msra.mxu0 %v1967_v29  ;;  %v3527_v29 = vld [vmem:[%s5249_s5 + $0xa8] sm:$0xff] }
 0x628   : > { %3922 = vmatprep.subr.bf16.mxu0 %v4249_v3  ;;  %v2341_v30 = vpack.c.bf16 %v3527_v29, %v3526_v28 }
 0x6f5   : > { %v1847_v59 = vpop.f32.mrb[44].mxu0 }
 0x6f6   : > { %v1848_v60 = vadd.f32 %v3476_v58, %v1847_v59  ;;  %v3900_v61 = vpop.f32.mrb[45].mxu0  ;;  %v3497_v58 = vld [vmem:[%s5247_s3 + $0xf8] sm:$0xff]  ;;  %v3512_v59 = vld [vmem:[%s5248_s4 + $0xd0] sm:$0xff] }
 0x6f7   : > { %v1850_v62 = vpop.f32.mrb[46].mxu0  ;;  %v1973_v61 = vpack.c.bf16 %v3497_v58, %v3496_v57 }
 0x6f8   : > { %v1853_v63 = vmax.f32 %v1848_v60, 0.0  ;;  %v3901_v0 = vpop.f32.mrb[47].mxu0  ;;  %v3513_v60 = vld [vmem:[%s5248_s4 + $0xd8] sm:$0xff] }
 0x6f9   : > { %v2159_v62 = vpack.c.bf16 %v3513_v60, %v3512_v59  ;;  %v3507_v0 = vld [vmem:[%s5248_s4 + $0xa8] sm:$0xff] }
 0x6fa   : > { %v1862_v1 = vpack.c.bf16 %v1853_v63, %v1853_v63  ;;  %v3506_v63 = vld [vmem:[%s5248_s4 + $0xa0] sm:$0xff] }
 0x6fc   : > { %3911 = vmatmul.mubr.msk.bf16.vlgmr.msra.gmra.mrb[52].mxu1 %vm1874_vm5, %v1862_v1  ;;  %v3522_v1 = vld [vmem:[%s5249_s5 + $0x80] sm:$0xff] }
 0x6fd   : > { %3934 = vmatprep.mubr.msk.bf16.mxu1 %vm4250_vm0, %v4249_v3  ;;  %3931 = vmatpush3.bf16.msra.mxu1 %v1970_v24  ;;  %v3533_v24 = vld [vmem:[%s5249_s5 + $0xd8] sm:$0xff] }
 0x6fe   : > { %3932 = vmatprep.subr.bf16.mxu1 %v4249_v3  ;;  %v2344_v26 = vpack.c.bf16 %v3533_v24, %v3532_v22 }
 0x701   : > { %3933 = vmatpush3.bf16.msra.mxu1 %v1971_v23  ;;  %v3528_v23 = vld [vmem:[%s5249_s5 + $0xb0] sm:$0xff] }
 0x702   : > { %3946 = vmatprep.subr.bf16.mxu1 %v4249_v3 }
 0x7cf   : > { %v1912_v4 = vpop.f32.mrb[52].mxu1 }
 0x7d0   : > { %v1913_v5 = vadd.f32 %v3478_v2, %v1912_v4  ;;  %v3912_v7 = vpop.f32.mrb[53].mxu1  ;;  %v3523_v2 = vld [vmem:[%s5249_s5 + $0x88] sm:$0xff]  ;;  %v2156_v4 = vpack.c.bf16 %v3507_v0, %v3506_v63 }
 0x7d1   : > { %v1915_v8 = vpop.f32.mrb[54].mxu1  ;;  %v3508_v7 = vld [vmem:[%s5248_s4 + $0xb0] sm:$0xff] }
 0x7d2   : > { %v3913_v9 = vpop.f32.mrb[55].mxu1  ;;  %v1918_v10 = vadd.f32 %v1913_v5, %v1795_v50  ;;  %v2155_v50 = vpack.c.bf16 %v3505_v48, %v3504_v47  ;;  %v2339_v5 = vpack.c.bf16 %v3523_v2, %v3522_v1  ;;  %v3509_v8 = vld [vmem:[%s5248_s4 + $0xb8] sm:$0xff] }
 0x7d3   : > { %v3524_v9 = vld [vmem:[%s5249_s5 + $0x90] sm:$0xff] }
 0x7d4   : > { %v1921_v11 = vsel %vm590_vm1, %v1918_v10, 0.0 }
 0x7d5   : > { %1922 = vadd.xlane.f32.xlu0 %v1921_v11  ;;  %v2157_v11 = vpack.c.bf16 %v3509_v8, %v3508_v7 }
 0x862   : > { %v1923_v12 = vpop.xlane.xlu0 %1922 }
 0x863   : > { %v1924_v13 = vmul.f32 0.03125, %v1923_v12 }
 0x865   : > { %v1925_v14 = vsub.f32 %v1918_v10, %v1924_v13  ;;  %v3525_v10 = vld [vmem:[%s5249_s5 + $0x98] sm:$0xff]  ;;  %v3514_v13 = vld [vmem:[%s5248_s4 + $0xe0] sm:$0xff] }
 0x866   : > { %v2340_v12 = vpack.c.bf16 %v3525_v10, %v3524_v9 }
 0x867   : > { %v1926_v15 = vmul.f32 %v1925_v14, %v1925_v14 }
 0x869   : > { %v1927_v17 = vsel %vm590_vm1, %v1926_v15, 0.0  ;;  %v3530_v15 = vld [vmem:[%s5249_s5 + $0xc0] sm:$0xff] }
 0x86a   : > { %1928 = vadd.xlane.f32.xlu1 %v1927_v17  ;;  %v3531_v17 = vld [vmem:[%s5249_s5 + $0xc8] sm:$0xff] }
 0x86b   : > { %v2343_v20 = vpack.c.bf16 %v3531_v17, %v3530_v15 }
 0x8f7   : > { %v1929_v16 = vpop.xlane.xlu1 %1928 }
 0x8f8   : > { %v1930_v31 = vmul.f32 0.03125, %v1929_v16  ;;  %v3529_v16 = vld [vmem:[%s5249_s5 + $0xb8] sm:$0xff] }
 0x8fa   : > { %v1931_v32 = vadd.f32 1e-06, %v1930_v31  ;;  %v2342_v31 = vpack.c.bf16 %v3529_v16, %v3528_v23 }
 0x8fc   : > { %4161 = vrsqrt.f32 %v1931_v32  ;;  %v3534_v32 = vld [vmem:[%s5249_s5 + $0xe0] sm:$0xff] }
 0x906   : > { %v4162_v33 = vpop.eup %4161 }
 0x907   : > { %v1933_v34 = vmul.f32 %v4162_v33, %v1925_v14  ;;  %v3515_v14 = vld [vmem:[%s5248_s4 + $0xe8] sm:$0xff] }
 0x908   : > { %v2160_v18 = vpack.c.bf16 %v3515_v14, %v3514_v13  ;;  %v3535_v33 = vld [vmem:[%s5249_s5 + $0xe8] sm:$0xff] }
 0x909   : > { %v1940_v37 = vmul.f32 %v3480_v19, %v1933_v34  ;;  %v2345_v19 = vpack.c.bf16 %v3535_v33, %v3534_v32  ;;  %v3536_v34 = vld [vmem:[%s5249_s5 + $0xf0] sm:$0xff] }
 0x90b   : > { %v4845_v41 = vadd.f32 %v3481_v35, %v1940_v37  ;;  %v3537_v35 = vld [vmem:[%s5249_s5 + $0xf8] sm:$0xff] }
 0x90c   : > { %v2346_v36 = vpack.c.bf16 %v3537_v35, %v3536_v34 }
 0x90d   : > { %v4852_v45 = vpack.c.bf16 %v4845_v41, %v4845_v41 }
 0x90f   : > { %3919 = vmatmul.mubr.msk.bf16.vlgmr.msra.gmra.mrb[48].mxu0 %vm590_vm1, %v4852_v45  ;;  %3935 = vmatmul.mubr.msk.bf16.vlgmr.msra.gmra.mrb[56].mxu1 %vm590_vm1, %v4852_v45 }
 0x910   : > { %3923 = vmatpush3.bf16.msra.mxu0 %v1968_v42  ;;  %3947 = vmatpush3.bf16.msra.mxu1 %v2154_v43 }
 0x911   : > { %3924 = vmatprep.subr.bf16.mxu0 %v4249_v3  ;;  %3948 = vmatprep.subr.bf16.mxu1 %v4249_v3 }
 0x912   : > { %3926 = vmatprep.mubr.msk.bf16.mxu0 %vm4250_vm0, %v4249_v3  ;;  %3950 = vmatprep.mubr.msk.bf16.mxu1 %vm4250_vm0, %v4249_v3 }
 0x914   : > { %3925 = vmatpush3.bf16.msra.mxu0 %v1969_v49  ;;  %3949 = vmatpush3.bf16.msra.mxu1 %v2155_v50 }
 0x915   : > { %3938 = vmatprep.subr.bf16.mxu0 %v4249_v3  ;;  %3962 = vmatprep.subr.bf16.mxu1 %v4249_v3 }
 0x917   : > { %3927 = vmatmul.mubr.msk.bf16.vlgmr.msra.gmra.mrb[52].mxu0 %vm590_vm1, %v4852_v45  ;;  %3951 = vmatmul.mubr.msk.bf16.vlgmr.msra.gmra.mrb[60].mxu1 %vm590_vm1, %v4852_v45 }
 0x918   : > { %3939 = vmatpush3.bf16.msra.mxu0 %v1972_v55  ;;  %3963 = vmatpush3.bf16.msra.mxu1 %v2158_v56 }
 0x919   : > { %3940 = vmatprep.subr.bf16.mxu0 %v4249_v3  ;;  %3964 = vmatprep.subr.bf16.mxu1 %v4249_v3 }
 0x91a   : > { %3942 = vmatprep.mubr.msk.bf16.mxu0 %vm4250_vm0, %v4249_v3  ;;  %3966 = vmatprep.mubr.msk.bf16.mxu1 %vm4250_vm0, %v4249_v3 }
 0x91c   : > { %3941 = vmatpush3.bf16.msra.mxu0 %v1973_v61  ;;  %3965 = vmatpush3.bf16.msra.mxu1 %v2159_v62 }
 0x91d   : > { %3954 = vmatprep.subr.bf16.mxu0 %v4249_v3  ;;  %3978 = vmatprep.subr.bf16.mxu1 %v4249_v3 }
 0x91f   : > { %3943 = vmatmul.mubr.msk.bf16.vlgmr.msra.gmra.mrb[56].mxu0 %vm590_vm1, %v4852_v45  ;;  %3967 = vmatmul.mubr.msk.bf16.vlgmr.msra.gmra.mrb[64].mxu1 %vm590_vm1, %v4852_v45 }
 0x920   : > { %3955 = vmatpush3.bf16.msra.mxu0 %v2156_v4  ;;  %3979 = vmatpush3.bf16.msra.mxu1 %v2339_v5 }
 0x921   : > { %3956 = vmatprep.subr.bf16.mxu0 %v4249_v3  ;;  %3980 = vmatprep.subr.bf16.mxu1 %v4249_v3 }
 0x922   : > { %3958 = vmatprep.mubr.msk.bf16.mxu0 %vm4250_vm0, %v4249_v3  ;;  %3982 = vmatprep.mubr.msk.bf16.mxu1 %vm4250_vm0, %v4249_v3 }
 0x924   : > { %3957 = vmatpush3.bf16.msra.mxu0 %v2157_v11  ;;  %3981 = vmatpush3.bf16.msra.mxu1 %v2340_v12 }
 0x925   : > { %3970 = vmatprep.subr.bf16.mxu0 %v4249_v3  ;;  %3994 = vmatprep.subr.bf16.mxu1 %v4249_v3 }
 0x927   : > { %3959 = vmatmul.mubr.msk.bf16.vlgmr.msra.gmra.mrb[60].mxu0 %vm590_vm1, %v4852_v45  ;;  %3983 = vmatmul.mubr.msk.bf16.vlgmr.msra.gmra.mrb[68].mxu1 %vm590_vm1, %v4852_v45 }
 0x928   : > { %3971 = vmatpush3.bf16.msra.mxu0 %v2160_v18  ;;  %3995 = vmatpush3.bf16.msra.mxu1 %v2343_v20 }
 0x929   : > { %3972 = vmatprep.subr.bf16.mxu0 %v4249_v3  ;;  %3996 = vmatprep.subr.bf16.mxu1 %v4249_v3 }
 0x92a   : > { %3974 = vmatprep.mubr.msk.bf16.mxu0 %vm4250_vm0, %v4249_v3  ;;  %3998 = vmatprep.mubr.msk.bf16.mxu1 %vm4250_vm0, %v4249_v3 }
 0x92c   : > { %3973 = vmatpush3.bf16.msra.mxu0 %v2161_v25  ;;  %3997 = vmatpush3.bf16.msra.mxu1 %v2344_v26 }
 0x92d   : > { %3986 = vmatprep.subr.bf16.mxu0 %v4249_v3  ;;  %4010 = vmatprep.subr.bf16.mxu1 %v4249_v3 }
 0x92f   : > { %3975 = vmatmul.mubr.msk.bf16.vlgmr.msra.gmra.mrb[64].mxu0 %vm590_vm1, %v4852_v45  ;;  %3999 = vmatmul.mubr.msk.bf16.vlgmr.msra.gmra.mrb[72].mxu1 %vm590_vm1, %v4852_v45 }
 0x930   : > { %3987 = vmatpush3.bf16.msra.mxu0 %v2341_v30  ;;  %3990 = vmatprep.mubr.msk.bf16.mxu0 %vm4250_vm0, %v4249_v3 }
 0x931   : > { %3988 = vmatprep.subr.bf16.mxu0 %v4249_v3  ;;  %4012 = vmatprep.mubr.msk.bf16.mxu1 %vm4250_vm0, %v4249_v3 }
 0x934   : > { %3989 = vmatpush3.bf16.msra.mxu0 %v2342_v31 }
 0x935   : > { %4002 = vmatprep.subr.bf16.mxu0 %v4249_v3 }
 0x937   : > { %3991 = vmatmul.mubr.msk.bf16.vlgmr.msra.gmra.mrb[68].mxu0 %vm590_vm1, %v4852_v45 }
 0x938   : > { %4003 = vmatpush3.bf16.msra.mxu0 %v2345_v19  ;;  %4006 = vmatprep.mubr.msk.bf16.mxu0 %vm4250_vm0, %v4249_v3 }
 0x939   : > { %4004 = vmatprep.subr.bf16.mxu0 %v4249_v3 }
 0x93c   : > { %4005 = vmatpush3.bf16.msra.mxu0 %v2346_v36 }
 0x93d   : > { %4016 = vmatprep.subr.bf16.mxu0 %v4249_v3 }
 0x93f   : > { %4007 = vmatmul.mubr.msk.bf16.vlgmr.msra.gmra.mrb[72].mxu0 %vm590_vm1, %v4852_v45 }
 0x940   : > { %4018 = vmatprep.mubr.msk.bf16.mxu0 %vm4250_vm0, %v4249_v3 }
 0x9e2   : > { %v2011_v37 = vpop.f32.mrb[48].mxu0  ;;  %v2091_v38 = vpop.f32.mrb[56].mxu1 }
 0x9e3   : > { %v3920_v39 = vpop.f32.mrb[49].mxu0  ;;  %v3936_v40 = vpop.f32.mrb[57].mxu1  ;;  %v2507_v56 = vmul.f32 0.35355338, %v2011_v37  ;;  %v2509_v5 = vmul.f32 0.35355338, %v2091_v38 }
 0x9e4   : > { %v2014_v42 = vpop.f32.mrb[50].mxu0  ;;  %v2094_v43 = vpop.f32.mrb[58].mxu1 }
 0x9e5   : > { %v3921_v44 = vpop.f32.mrb[51].mxu0  ;;  %v3937_v46 = vpop.f32.mrb[59].mxu1  ;;  %v2511_v59 = vpack.c.bf16 %v2507_v56, %v2507_v56  ;;  %v2513_v9 = vpack.c.bf16 %v2509_v5, %v2509_v5 }
 0x9ea   : > { %v2051_v47 = vpop.f32.mrb[52].mxu0  ;;  %v2196_v48 = vpop.f32.mrb[60].mxu1 }
 0x9eb   : > { %v2515_v49 = vpack.c.bf16 %v2196_v48, %v2196_v48  ;;  %v3928_v50 = vpop.f32.mrb[53].mxu0  ;;  %v3952_v51 = vpop.f32.mrb[61].mxu1  ;;  %v2508_v6 = vmul.f32 0.35355338, %v2051_v47 }
 0x9ec   : > { %v2054_v52 = vpop.f32.mrb[54].mxu0  ;;  %v2199_v53 = vpop.f32.mrb[62].mxu1 }
 0x9ed   : > { %v2523_v45 = vsel %vm1140_vm2, %v2515_v49, 0  ;;  %v3929_v54 = vpop.f32.mrb[55].mxu0  ;;  %v3953_v55 = vpop.f32.mrb[63].mxu1  ;;  %v2512_v25 = vpack.c.bf16 %v2508_v6, %v2508_v6 }
 0x9ee   : > { %4011 = vmatpush3.bf16.xpose.msra.mxu1 %v2523_v45 }
 0x9ef   : > { %4022 = vmatprep.subr.bf16.mxu1 %v4249_v3 }
 0x9f2   : > { %v2131_v57 = vpop.f32.mrb[56].mxu0  ;;  %v2276_v58 = vpop.f32.mrb[64].mxu1 }
 0x9f3   : > { %v2517_v60 = vpack.c.bf16 %v2276_v58, %v2276_v58  ;;  %v3944_v61 = vpop.f32.mrb[57].mxu0  ;;  %v3968_v62 = vpop.f32.mrb[65].mxu1  ;;  %v2510_v33 = vmul.f32 0.35355338, %v2131_v57 }
 0x9f4   : > { %v2134_v63 = vpop.f32.mrb[58].mxu0  ;;  %v2279_v0 = vpop.f32.mrb[66].mxu1 }
 0x9f5   : > { %v2615_v1 = vsel %vm1140_vm2, %v2517_v60, 0  ;;  %v3945_v2 = vpop.f32.mrb[59].mxu0  ;;  %v3969_v4 = vpop.f32.mrb[67].mxu1  ;;  %4013 = vmatmul.mubr.msk.bf16.vlgmr.msra.gmra.mrb[76].mxu1 %vm1140_vm2, %v2511_v59  ;;  %v2514_v34 = vpack.c.bf16 %v2510_v33, %v2510_v33 }
 0x9f6   : > { %4023 = vmatpush3.bf16.xpose.msra.mxu1 %v2615_v1  ;;  %4024 = vmatprep.mubr.msk.bf16.mxu1 %vm4250_vm0, %v4249_v3 }
 0x9f7   : > { %4034 = vmatprep.subr.bf16.mxu1 %v4249_v3 }
 0x9fa   : > { %v2236_v7 = vpop.f32.mrb[60].mxu0  ;;  %v2381_v8 = vpop.f32.mrb[68].mxu1 }
 0x9fb   : > { %v2516_v10 = vpack.c.bf16 %v2236_v7, %v2236_v7  ;;  %v2751_v11 = vpack.c.bf16 %v2381_v8, %v2381_v8  ;;  %v3960_v12 = vpop.f32.mrb[61].mxu0  ;;  %v3984_v13 = vpop.f32.mrb[69].mxu1 }
 0x9fc   : > { %v2239_v14 = vpop.f32.mrb[62].mxu0  ;;  %v2384_v15 = vpop.f32.mrb[70].mxu1 }
 0x9fd   : > { %v2569_v17 = vsel %vm1140_vm2, %v2516_v10, 0  ;;  %v2759_v18 = vsel %vm1380_vm3, %v2751_v11, 0  ;;  %v3961_v20 = vpop.f32.mrb[63].mxu0  ;;  %v3985_v21 = vpop.f32.mrb[71].mxu1  ;;  %4025 = vmatmul.mubr.msk.bf16.vlgmr.msra.gmra.mrb[80].mxu1 %vm1140_vm2, %v2513_v9 }
 0x9fe   : > { %4017 = vmatpush3.bf16.xpose.msra.mxu0 %v2569_v17  ;;  %4035 = vmatpush3.bf16.msra.mxu1 %v2759_v18 }
 0x9ff   : > { %4028 = vmatprep.subr.bf16.mxu0 %v4249_v3  ;;  %4036 = vmatprep.mubr.msk.bf16.mxu1 %vm4250_vm0, %v4249_v3 }
 0xa00   : > { %4046 = vmatprep.subr.bf16.mxu1 %v4249_v3 }
 0xa02   : > { %v2316_v22 = vpop.f32.mrb[64].mxu0  ;;  %v5041_v24 = vpop.f32.mrb[72].mxu1 }
 0xa03   : > { %v2518_v26 = vpack.c.bf16 %v2316_v22, %v2316_v22  ;;  %v3976_v28 = vpop.f32.mrb[65].mxu0  ;;  %v4000_v29 = vpop.f32.mrb[73].mxu1 }
 0xa04   : > { %v2319_v30 = vpop.f32.mrb[66].mxu0  ;;  %v2464_v23 = vpop.f32.mrb[74].mxu1 }
 0xa05   : > { %v2661_v16 = vsel %vm1140_vm2, %v2518_v26, 0  ;;  %v3977_v31 = vpop.f32.mrb[67].mxu0  ;;  %v4001_v32 = vpop.f32.mrb[75].mxu1  ;;  %4019 = vmatmul.mubr.msk.bf16.vlgmr.msra.gmra.mrb[76].mxu0 %vm1140_vm2, %v2512_v25 }
 0xa06   : > { %4029 = vmatpush3.bf16.xpose.msra.mxu0 %v2661_v16  ;;  %4030 = vmatprep.mubr.msk.bf16.mxu0 %vm4250_vm0, %v4249_v3  ;;  %v2753_v31 = vpack.c.bf16 %v5041_v24, %v5041_v24 }
 0xa07   : > { %4040 = vmatprep.subr.bf16.mxu0 %v4249_v3 }
 0xa0a   : > { %v2421_v19 = vpop.f32.mrb[68].mxu0 }
 0xa0b   : > { %v2752_v35 = vpack.c.bf16 %v2421_v19, %v2421_v19  ;;  %v3992_v36 = vpop.f32.mrb[69].mxu0  ;;  %v2851_v19 = vsel %vm1380_vm3, %v2753_v31, 0 }
 0xa0c   : > { %v2424_v37 = vpop.f32.mrb[70].mxu0 }
 0xa0d   : > { %v2805_v38 = vsel %vm1380_vm3, %v2752_v35, 0  ;;  %v3993_v39 = vpop.f32.mrb[71].mxu0  ;;  %4031 = vmatmul.mubr.msk.bf16.vlgmr.msra.gmra.mrb[80].mxu0 %vm1140_vm2, %v2514_v34 }
 0xa0e   : > { %4041 = vmatpush3.bf16.msra.mxu0 %v2805_v38  ;;  %4042 = vmatprep.mubr.msk.bf16.mxu0 %vm4250_vm0, %v4249_v3 }
 0xa0f   : > { %4052 = vmatprep.subr.bf16.mxu0 %v4249_v3 }
 0xa12   : > { %v5053_v40 = vpop.f32.mrb[72].mxu0 }
 0xa13   : > { %v4008_v42 = vpop.f32.mrb[73].mxu0  ;;  %v2754_v39 = vpack.c.bf16 %v5053_v40, %v5053_v40  ;;  %v3550_v40 = vld [vmem:[%s5250_s6 + $0x20] sm:$0xff] }
 0xa14   : > { %v2504_v43 = vpop.f32.mrb[74].mxu0 }
 0xa15   : > { %v4009_v44 = vpop.f32.mrb[75].mxu0 }
 0xa16   : > { %v2897_v44 = vsel %vm1380_vm3, %v2754_v39, 0 }
 0xac8   : > { %v2559_v46 = vpop.f32.mrb[76].mxu1 }
 0xac9   : > { %v2560_v47 = vadd.f32 %v2559_v46, %v4664_v27  ;;  %v4014_v48 = vpop.f32.mrb[77].mxu1 }
 0xaca   : > { %v2562_v49 = vpop.f32.mrb[78].mxu1 }
 0xacb   : > { %v4015_v50 = vpop.f32.mrb[79].mxu1  ;;  %v2703_v51 = vsel %vm1140_vm2, %v2560_v47, -inf  ;;  %v2948_v49 = vpack.c.bf16 %v3550_v40, %v3550_v40  ;;  %v3562_v40 = vld [vmem:[%s5253_s9 + $0x20] sm:$0xff] }
 0xacc   : > { %2704 = vmax.xlane.f32.xlu0 %v2703_v51  ;;  %v3551_v51 = vld [vmem:[%s5250_s6 + $0x28] sm:$0xff] }
 0xacd   : > { %v2956_v50 = vsel %vm1380_vm3, %v2948_v49, 0  ;;  %v3563_v49 = vld [vmem:[%s5253_s9 + $0x28] sm:$0xff] }
 0xad0   : > { %v2651_v52 = vpop.f32.mrb[80].mxu1 }
 0xad1   : > { %v2652_v53 = vadd.f32 %v2651_v52, %v4664_v27  ;;  %v4026_v45 = vpop.f32.mrb[81].mxu1  ;;  %v2949_v52 = vpack.c.bf16 %v3551_v51, %v3551_v51  ;;  %v3565_v51 = vld [vmem:[%s5253_s9 + $0x38] sm:$0xff] }
 0xad2   : > { %v2654_v54 = vpop.f32.mrb[82].mxu1  ;;  %v3552_v45 = vld [vmem:[%s5250_s6 + $0x30] sm:$0xff] }
 0xad3   : > { %v4027_v55 = vpop.f32.mrb[83].mxu1  ;;  %v2709_v56 = vsel %vm1140_vm2, %v2652_v53, -inf  ;;  %v2950_v54 = vpack.c.bf16 %v3552_v45, %v3552_v45  ;;  %v3570_v45 = vld [vmem:[%s5255_s11 + $0x48] sm:$0xff] }
 0xad4   : > { %2710 = vmax.xlane.f32.xlu0 %v2709_v56 }
 0xad8   : > { %v2605_v57 = vpop.f32.mrb[76].mxu0 }
 0xad9   : > { %v2606_v58 = vadd.f32 %v2605_v57, %v4664_v27  ;;  %v4020_v59 = vpop.f32.mrb[77].mxu0 }
 0xada   : > { %v2608_v60 = vpop.f32.mrb[78].mxu0 }
 0xadb   : > { %v4021_v61 = vpop.f32.mrb[79].mxu0  ;;  %v2706_v62 = vsel %vm1140_vm2, %v2606_v58, -inf }
 0xadc   : > { %2707 = vmax.xlane.f32.xlu1 %v2706_v62 }
 0xae0   : > { %v2697_v63 = vpop.f32.mrb[80].mxu0 }
 0xae1   : > { %v2698_v0 = vadd.f32 %v2697_v63, %v4664_v27  ;;  %v4032_v1 = vpop.f32.mrb[81].mxu0 }
 0xae2   : > { %v2700_v2 = vpop.f32.mrb[82].mxu0  ;;  %v3553_v1 = vld [vmem:[%s5250_s6 + $0x38] sm:$0xff] }
 0xae3   : > { %v4033_v4 = vpop.f32.mrb[83].mxu0  ;;  %v2712_v5 = vsel %vm1140_vm2, %v2698_v0, -inf }
 0xae4   : > { %2713 = vmax.xlane.f32.xlu1 %v2712_v5  ;;  %v2951_v4 = vpack.c.bf16 %v3553_v1, %v3553_v1 }
 0xb59   : > { %v2705_v7 = vpop.xlane.xlu0 %2704 }
 0xb5a   : > { %v2715_v8 = vsub.f32 %v2560_v47, %v2705_v7 }
 0xb5c   : > { %v2719_v9 = vmul.f32 1.442695, %v2715_v8 }
 0xb5e   : > { %4163 = vpow2.f32 %v2719_v9  ;;  %v3094_v9 = vsel %vm1380_vm3, %v2951_v4, 0 }
 0xb61   : > { %v2711_v10 = vpop.xlane.xlu0 %2710 }
 0xb62   : > { %v2717_v11 = vsub.f32 %v2652_v53, %v2711_v10  ;;  %v3002_v53 = vsel %vm1380_vm3, %v2949_v52, 0 }
 0xb64   : > { %v2723_v12 = vmul.f32 1.442695, %v2717_v11 }
 0xb66   : > { %4165 = vpow2.f32 %v2723_v12 }
 0xb68   : > { %v4164_v13 = vpop.eup %4163 }
 0xb69   : > { %v2708_v14 = vpop.xlane.xlu1 %2707  ;;  %v2727_v15 = vsel %vm1140_vm2, %v4164_v13, 0.0 }
 0xb6a   : > { %v2716_v17 = vsub.f32 %v2606_v58, %v2708_v14  ;;  %2728 = vadd.xlane.f32.xlu0 %v2727_v15  ;;  %v3048_v58 = vsel %vm1380_vm3, %v2950_v54, 0  ;;  %v3571_v54 = vld [vmem:[%s5255_s11 + $0x50] sm:$0xff] }
 0xb6c   : > { %v2721_v27 = vmul.f32 1.442695, %v2716_v17 }
 0xb6e   : > { %4167 = vpow2.f32 %v2721_v27 }
 0xb70   : > { %v4166_v18 = vpop.eup %4165 }
 0xb71   : > { %v2714_v20 = vpop.xlane.xlu1 %2713  ;;  %v2733_v21 = vsel %vm1140_vm2, %v4166_v18, 0.0 }
 0xb72   : > { %v2718_v6 = vsub.f32 %v2698_v0, %v2714_v20  ;;  %2734 = vadd.xlane.f32.xlu0 %v2733_v21 }
 0xb74   : > { %v2725_v22 = vmul.f32 1.442695, %v2718_v6 }
 0xb76   : > { %4169 = vpow2.f32 %v2725_v22 }
 0xb78   : > { %v4168_v25 = vpop.eup %4167 }
 0xb79   : > { %v2730_v26 = vsel %vm1140_vm2, %v4168_v25, 0.0 }
 0xb7a   : > { %2731 = vadd.xlane.f32.xlu1 %v2730_v26 }
 0xb80   : > { %v4170_v28 = vpop.eup %4169 }
 0xb81   : > { %v2736_v29 = vsel %vm1140_vm2, %v4170_v28, 0.0 }
 0xb82   : > { %2737 = vadd.xlane.f32.xlu1 %v2736_v29 }
 0xbf7   : > { %v2729_v30 = vpop.xlane.xlu0 %2728 }
 0xbf8   : > { %4171 = vrcp.f32 %v2729_v30 }
 0xbff   : > { %v2735_v23 = vpop.xlane.xlu0 %2734 }
 0xc00   : > { %4173 = vrcp.f32 %v2735_v23 }
 0xc02   : > { %v4172_v16 = vpop.eup %4171 }
 0xc03   : > { %v2740_v32 = vmul.f32 %v4172_v16, %v4164_v13 }
 0xc05   : > { %v2747_v33 = vpack.c.bf16 %v2740_v32, %v2740_v32 }
 0xc07   : > { %v2732_v34 = vpop.xlane.xlu1 %2731  ;;  %4037 = vmatmul.mubr.msk.bf16.vlgmr.msra.gmra.mrb[84].mxu1 %vm1140_vm2, %v2747_v33 }
 0xc08   : > { %4175 = vrcp.f32 %v2732_v34  ;;  %4047 = vmatpush3.bf16.msra.mxu1 %v2851_v19  ;;  %4048 = vmatprep.mubr.msk.bf16.mxu1 %vm4250_vm0, %v4249_v3 }
 0xc09   : > { %4058 = vmatprep.subr.bf16.mxu1 %v4249_v3 }
 0xc0a   : > { %v4174_v35 = vpop.eup %4173 }
 0xc0b   : > { %v2744_v36 = vmul.f32 %v4174_v35, %v4166_v18 }
 0xc0d   : > { %v2749_v37 = vpack.c.bf16 %v2744_v36, %v2744_v36 }
 0xc0f   : > { %v2738_v38 = vpop.xlane.xlu1 %2737  ;;  %4049 = vmatmul.mubr.msk.bf16.vlgmr.msra.gmra.mrb[88].mxu1 %vm1140_vm2, %v2749_v37 }
 0xc10   : > { %4177 = vrcp.f32 %v2738_v38  ;;  %4060 = vmatprep.mubr.msk.bf16.mxu1 %vm4250_vm0, %v4249_v3  ;;  %4059 = vmatpush3.bf16.msra.mxu1 %v2956_v50  ;;  %v3181_v50 = vpack.c.bf16 %v3563_v49, %v3562_v40 }
 0xc11   : > { %4070 = vmatprep.subr.bf16.mxu1 %v4249_v3 }
 0xc12   : > { %v4176_v24 = vpop.eup %4175 }
 0xc13   : > { %v2742_v42 = vmul.f32 %v4176_v24, %v4168_v25 }
 0xc15   : > { %v2748_v43 = vpack.c.bf16 %v2742_v42, %v2742_v42 }
 0xc17   : > { %4043 = vmatmul.mubr.msk.bf16.vlgmr.msra.gmra.mrb[84].mxu0 %vm1140_vm2, %v2748_v43 }
 0xc18   : > { %4053 = vmatpush3.bf16.msra.mxu0 %v2897_v44  ;;  %4054 = vmatprep.mubr.msk.bf16.mxu0 %vm4250_vm0, %v4249_v3 }
 0xc19   : > { %4064 = vmatprep.subr.bf16.mxu0 %v4249_v3 }
 0xc1a   : > { %v4178_v46 = vpop.eup %4177 }
 0xc1b   : > { %v2746_v47 = vmul.f32 %v4178_v46, %v4170_v28 }
 0xc1d   : > { %v2750_v48 = vpack.c.bf16 %v2746_v47, %v2746_v47 }
 0xc1f   : > { %4055 = vmatmul.mubr.msk.bf16.vlgmr.msra.gmra.mrb[88].mxu0 %vm1140_vm2, %v2750_v48 }
 0xc20   : > { %4066 = vmatprep.mubr.msk.bf16.mxu0 %vm4250_vm0, %v4249_v3  ;;  %4065 = vmatpush3.bf16.msra.mxu0 %v3002_v53  ;;  %v3569_v53 = vld [vmem:[%s5255_s11 + $0x40] sm:$0xff] }
 0xc21   : > { %4076 = vmatprep.subr.bf16.mxu0 %v4249_v3 }
 0xcda   : > { %v2795_v55 = vpop.f32.mrb[84].mxu1 }
 0xcdb   : > { %v2944_v56 = vpack.c.bf16 %v2795_v55, %v2795_v55  ;;  %v4038_v57 = vpop.f32.mrb[85].mxu1  ;;  %v3245_v55 = vpack.c.bf16 %v3570_v45, %v3569_v53  ;;  %v3585_v53 = vld [vmem:[%s5285_s27] ss:$0 sm:$0xff] }
 0xcdc   : > { %v2798_v59 = vpop.f32.mrb[86].mxu1 }
 0xcdd   : > { %v4039_v60 = vpop.f32.mrb[87].mxu1  ;;  %4061 = vmatmul.mubr.msk.bf16.vlgmr.msra.gmra.mrb[92].mxu1 %vm1140_vm2, %v2944_v56  ;;  %v3572_v56 = vld [vmem:[%s5255_s11 + $0x58] sm:$0xff] }
 0xcde   : > { %4071 = vmatpush3.bf16.msra.mxu1 %v3048_v58  ;;  %4072 = vmatprep.mubr.msk.bf16.mxu1 %vm4250_vm0, %v4249_v3  ;;  %v3246_v57 = vpack.c.bf16 %v3572_v56, %v3571_v54 }
 0xcdf   : > { %4082 = vmatprep.subr.bf16.mxu1 %v4249_v3 }
 0xce2   : > { %v2887_v61 = vpop.f32.mrb[88].mxu1 }
 0xce3   : > { %v2946_v62 = vpack.c.bf16 %v2887_v61, %v2887_v61  ;;  %v4050_v63 = vpop.f32.mrb[89].mxu1 }
 0xce4   : > { %v2890_v0 = vpop.f32.mrb[90].mxu1 }
 0xce5   : > { %v4051_v2 = vpop.f32.mrb[91].mxu1  ;;  %4073 = vmatmul.mubr.msk.bf16.vlgmr.msra.gmra.mrb[96].mxu1 %vm1140_vm2, %v2946_v62  ;;  %v3560_v62 = vld [vmem:[%s5251_s7 + $0x1] ss:$0 sm:$0xff] }
 0xce6   : > { %4086 = vmatprep.mubr.msk.bf16.mxu1 %vm4250_vm0, %v4249_v3  ;;  %4083 = vmatpush3.bf16.msra.mxu1 %v3181_v50  ;;  %v3561_v0 = vld [vmem:[%s5252_s8 + $0x1] ss:$0 sm:$0xff] }
 0xce7   : > { %4084 = vmatprep.subr.bf16.mxu1 %v4249_v3 }
 0xcea   : > { %v2841_v5 = vpop.f32.mrb[84].mxu0 }
 0xceb   : > { %v2945_v7 = vpack.c.bf16 %v2841_v5, %v2841_v5  ;;  %v4044_v8 = vpop.f32.mrb[85].mxu0  ;;  %v3573_v5 = vld [vmem:[%s5255_s11 + $0x60] sm:$0xff] }
 0xcec   : > { %v2844_v10 = vpop.f32.mrb[86].mxu0 }
 0xced   : > { %v4045_v11 = vpop.f32.mrb[87].mxu0  ;;  %4067 = vmatmul.mubr.msk.bf16.vlgmr.msra.gmra.mrb[92].mxu0 %vm1140_vm2, %v2945_v7  ;;  %v3574_v7 = vld [vmem:[%s5255_s11 + $0x68] sm:$0xff]  ;;  %v3576_v10 = vld [vmem:[%s5255_s11 + $0x78] sm:$0xff] }
 0xcee   : > { %4077 = vmatpush3.bf16.msra.mxu0 %v3094_v9  ;;  %4078 = vmatprep.mubr.msk.bf16.mxu0 %vm4250_vm0, %v4249_v3  ;;  %v3247_v8 = vpack.c.bf16 %v3574_v7, %v3573_v5  ;;  %v3575_v9 = vld [vmem:[%s5255_s11 + $0x70] sm:$0xff] }
 0xcef   : > { %4090 = vmatprep.subr.bf16.mxu0 %v4249_v3  ;;  %v3248_v11 = vpack.c.bf16 %v3576_v10, %v3575_v9 }
 0xcf2   : > { %v2933_v12 = vpop.f32.mrb[88].mxu0 }
 0xcf3   : > { %v2947_v13 = vpack.c.bf16 %v2933_v12, %v2933_v12  ;;  %v4056_v14 = vpop.f32.mrb[89].mxu0  ;;  %v3567_v12 = vld [vmem:[%s5254_s10 + $0x1] ss:$0 sm:$0xff] }
 0xcf4   : > { %v2936_v15 = vpop.f32.mrb[90].mxu0 }
 0xcf5   : > { %v4057_v17 = vpop.f32.mrb[91].mxu0  ;;  %4079 = vmatmul.mubr.msk.bf16.vlgmr.msra.gmra.mrb[96].mxu0 %vm1140_vm2, %v2947_v13 }
 0xcf6   : > { %4098 = vmatprep.mubr.msk.bf16.mxu0 %vm4250_vm0, %v4249_v3  ;;  %4091 = vmatpush3.bf16.msra.mxu0 %v3245_v55 }
 0xcf7   : > { %4092 = vmatprep.subr.bf16.mxu0 %v4249_v3 }
 0xcfa   : > { %4093 = vmatpush3.bf16.msra.mxu0 %v3246_v57 }
 0xcfb   : > { %4094 = vmatprep.subr.bf16.mxu0 %v4249_v3 }
 0xcfe   : > { %4095 = vmatpush3.bf16.msra.mxu0 %v3247_v8 }
 0xcff   : > { %4096 = vmatprep.subr.bf16.mxu0 %v4249_v3 }
 0xd02   : > { %4097 = vmatpush3.bf16.msra.mxu0 %v3248_v11 }
 0xdb0   : > { %v2992_v27 = vpop.f32.mrb[92].mxu1 }
 0xdb1   : > { %v4062_v18 = vpop.f32.mrb[93].mxu1  ;;  %v3136_v29 = vsel %vm590_vm1, %v2992_v27, 0.0 }
 0xdb2   : > { %v2995_v20 = vpop.f32.mrb[94].mxu1 }
 0xdb3   : > { %v4063_v21 = vpop.f32.mrb[95].mxu1  ;;  %v3578_v20 = vld [vmem:[%s5256_s12 + $0x1] ss:$0 sm:$0xff] }
 0xdb8   : > { %v3084_v6 = vpop.f32.mrb[96].mxu1 }
 0xdb9   : > { %v4074_v22 = vpop.f32.mrb[97].mxu1  ;;  %v3139_v32 = vsel %vm590_vm1, %v3084_v6, 0.0 }
 0xdba   : > { %v3087_v25 = vpop.f32.mrb[98].mxu1 }
 0xdbb   : > { %v4075_v26 = vpop.f32.mrb[99].mxu1 }
 0xdc0   : > { %v3038_v28 = vpop.f32.mrb[92].mxu0 }
 0xdc1   : > { %v3137_v30 = vsel %vm590_vm1, %v3038_v28, 0.0  ;;  %v4068_v23 = vpop.f32.mrb[93].mxu0 }
 0xdc2   : > { %v3138_v16 = vadd.f32 %v3137_v30, %v3136_v29  ;;  %v3041_v31 = vpop.f32.mrb[94].mxu0 }
 0xdc3   : > { %v4069_v33 = vpop.f32.mrb[95].mxu0 }
 0xdc4   : > { %v3140_v19 = vadd.f32 %v3139_v32, %v3138_v16 }
 0xdc8   : > { %v3130_v34 = vpop.f32.mrb[96].mxu0 }
 0xdc9   : > { %v3141_v35 = vsel %vm590_vm1, %v3130_v34, 0.0  ;;  %v4080_v36 = vpop.f32.mrb[97].mxu0 }
 0xdca   : > { %v3142_v37 = vadd.f32 %v3141_v35, %v3140_v19  ;;  %v3133_v38 = vpop.f32.mrb[98].mxu0  ;;  %v3582_v36 = vld [vmem:[%s5257_s13 + $0x1] ss:$0 sm:$0xff] }
 0xdcb   : > { %v4081_v24 = vpop.f32.mrb[99].mxu0  ;;  %v3583_v38 = vld [vmem:[%s5258_s14 + $0x1] ss:$0 sm:$0xff] }
 0xdcc   : > { %v3143_v39 = vadd.f32 %v3142_v37, %v4845_v41  ;;  %v3564_v41 = vld [vmem:[%s5253_s9 + $0x30] sm:$0xff] }
 0xdcd   : > { %v3182_v52 = vpack.c.bf16 %v3565_v51, %v3564_v41  ;;  %v3584_v51 = vld [vmem:[%s5284_s0] ss:$0 sm:$0xff]  ;;  %s4191_s0 = scalar_lea.vmem %s4190_s29, 256 }
 0xdce   : > { %v3148_v42 = vsel %vm590_vm1, %v3143_v39, 0.0  ;;  %p4193_p1 = scmp.lt.s32.totalorder %s4191_s0, %s4185_s18 }
 0xdcf   : > { %3149 = vadd.xlane.f32.xlu0 %v3148_v42  ;;  %4085 = vmatpush3.bf16.msra.mxu1 %v3182_v52 }
 0xdd0   : > { %p4194_p2 = por %p4193_p1, %p4192_p0 }
 0xdd2   : > { %p4195_p3 = pnand %p4194_p2, %p4188_p13 }
 0xe5c   : > { %v3150_v43 = vpop.xlane.xlu0 %3149 }
 0xe5d   : > { %v3151_v44 = vmul.f32 0.03125, %v3150_v43 }
 0xe5f   : > { %v3152_v46 = vsub.f32 %v3143_v39, %v3151_v44 }
 0xe61   : > { %v3153_v47 = vmul.f32 %v3152_v46, %v3152_v46 }
 0xe63   : > { %v3154_v48 = vsel %vm590_vm1, %v3153_v47, 0.0 }
 0xe64   : > { %3155 = vadd.xlane.f32.xlu1 %v3154_v48 }
 0xef1   : > { %v3156_v58 = vpop.xlane.xlu1 %3155 }
 0xef2   : > { %v3157_v59 = vmul.f32 0.03125, %v3156_v58 }
 0xef4   : > { %v3158_v60 = vadd.f32 1e-06, %v3157_v59 }
 0xef6   : > { %4179 = vrsqrt.f32 %v3158_v60 }
 0xf00   : > { %v4180_v61 = vpop.eup %4179 }
 0xf01   : > { %v3160_v63 = vmul.f32 %v4180_v61, %v3152_v46 }
 0xf03   : > { %v3167_v1 = vmul.f32 %v3560_v62, %v3160_v63 }
 0xf05   : > { %v3174_v2 = vadd.f32 %v3561_v0, %v3167_v1 }
 0xf07   : > { %v3180_v4 = vpack.c.bf16 %v3174_v2, %v3174_v2 }
 0xf09   : > { %4087 = vmatmul.mubr.msk.bf16.vlgmr.msra.gmra.mrb[100].mxu1 %vm590_vm1, %v3180_v4 }
 0xfdc   : > { %v3228_v13 = vpop.f32.mrb[100].mxu1 }
 0xfdd   : > { %v3229_v14 = vadd.f32 %v3567_v12, %v3228_v13  ;;  %v4088_v15 = vpop.f32.mrb[101].mxu1 }
 0xfde   : > { %v3231_v17 = vpop.f32.mrb[102].mxu1 }
 0xfdf   : > { %v3234_v27 = vmax.f32 %v3229_v14, 0.0  ;;  %v4089_v3 = vpop.f32.mrb[103].mxu1 }
 0xfe1   : > { %v3244_v18 = vpack.c.bf16 %v3234_v27, %v3234_v27 }
 0xfe3   : > { %4099 = vmatmul.mubr.msk.bf16.vlgmr.msra.gmra.mrb[100].mxu0 %vm1874_vm5, %v3244_v18 }
0x10b6   : > { %v3294_v21 = vpop.f32.mrb[100].mxu0 }
0x10b7   : > { %v3295_v6 = vadd.f32 %v3578_v20, %v3294_v21  ;;  %v4100_v22 = vpop.f32.mrb[101].mxu0 }
0x10b8   : > { %v3297_v25 = vpop.f32.mrb[102].mxu0 }
0x10b9   : > { %v4101_v26 = vpop.f32.mrb[103].mxu0  ;;  %v3300_v28 = vadd.f32 %v3295_v6, %v3174_v2 }
0x10bb   : > { %v3305_v29 = vsel %vm590_vm1, %v3300_v28, 0.0 }
0x10bc   : > { %3306 = vadd.xlane.f32.xlu0 %v3305_v29 }
0x1149   : > { %v3307_v30 = vpop.xlane.xlu0 %3306 }
0x114a   : > { %v3308_v23 = vmul.f32 0.03125, %v3307_v30 }
0x114c   : > { %v3309_v16 = vsub.f32 %v3300_v28, %v3308_v23 }
0x114e   : > { %v3310_v31 = vmul.f32 %v3309_v16, %v3309_v16 }
0x1150   : > { %v3311_v32 = vsel %vm590_vm1, %v3310_v31, 0.0 }
0x1151   : > { %3312 = vadd.xlane.f32.xlu1 %v3311_v32 }
0x11de   : > { %v3313_v33 = vpop.xlane.xlu1 %3312 }
0x11df   : > { %v3314_v19 = vmul.f32 0.03125, %v3313_v33 }
0x11e1   : > { %v3315_v34 = vadd.f32 1e-06, %v3314_v19 }
0x11e3   : > { %4181 = vrsqrt.f32 %v3315_v34 }
0x11ed   : > { %v4182_v35 = vpop.eup %4181 }
0x11ee   : > { %v3317_v37 = vmul.f32 %v4182_v35, %v3309_v16 }
0x11f0   : > { %v3324_v24 = vmul.f32 %v3582_v36, %v3317_v37 }
0x11f2   : > { %v3331_v39 = vadd.f32 %v3583_v38, %v3324_v24 }
0x11f4   : > { %v3334_v42 = vsel %vm590_vm1, %v3331_v39, 0.0 }
0x11f5   : > { %3335 = vadd.xlane.f32.xlu0 %v3334_v42 }
0x1282   : > { %v3336_v43 = vpop.xlane.xlu0 %3335 }
0x1283   : > { %v3337_v44 = vmul.f32 0.03125, %v3336_v43 }
0x1285   : > { %v3338_v46 = vsub.f32 %v3331_v39, %v3337_v44 }
0x1287   : > { %v3339_v47 = vmul.f32 %v3338_v46, %v3338_v46 }
0x1289   : > { %v3340_v48 = vsel %vm590_vm1, %v3339_v47, 0.0 }
0x128a   : > { %3341 = vadd.xlane.f32.xlu1 %v3340_v48 }
0x1317   : > { %v3342_v40 = vpop.xlane.xlu1 %3341 }
0x1318   : > { %v3343_v49 = vmul.f32 0.03125, %v3342_v40 }
0x131a   : > { %v3344_v50 = vadd.f32 1e-06, %v3343_v49 }
0x131c   : > { %4183 = vrsqrt.f32 %v3344_v50 }
0x1326   : > { %v4184_v41 = vpop.eup %4183 }
0x1327   : > { %v3346_v52 = vmul.f32 %v4184_v41, %v3338_v46 }
0x1329   : > { %v3353_v45 = vmul.f32 %v3584_v51, %v3346_v52 }
0x132b   : > { %v3360_v54 = vadd.f32 %v3585_v53, %v3353_v45 }
0x132d   : > { %3361 = vst.msk [vmem:[%s550_s16] sm:$0xff] %vm590_vm1, %v3360_v54 }
0x132e   : > { %4198 = shalt.err (!%p4195_p3)
}
0x132f   : > { %s4199_s23 = scalar_lea.hbm %s5201_s22, 128  ;;  %s4203_s27 = scalar_lea.hbm %s5286_s21, 256 }
0x1330   : > { %p4200_p4 = scmp.ne.s32.totalorder %s5201_s22, %s4199_s23  ;;  %p4204_p9 = scmp.lt.u32.totalorder %s5201_s22, %s5286_s21 }
0x1331   : > { %p4205_p10 = scmp.lt.u32.totalorder %s4203_s27, %s4199_s23  ;;  %p4207_p12 = scmp.lt.u32.totalorder %s4199_s23, %s5201_s22 }
0x1332   : > { %p4201_p7 = pnand %p4200_p4, %p4380_p5 }
0x1333   : > { %p4206_p11 = por %p4205_p10, %p4204_p9 }
0x1334   : > { %p4202_p8 = pneg %p4201_p7 }
0x1335   : > { %p4208_p13 = por %p4207_p12, %p4206_p11 }
0x1337   : > { %p4209_p0 = pnand %p4208_p13, %p4202_p8 }
0x1339   : > { %4212 = shalt.err (!%p4209_p0)
}
0x133a   : > { %4102 = dma.vmem_to_hbm [thread:$0]  (%p4380_p5), %s5203_s24, 128, %s5201_s22, %s3363_s30  }
0x133b PF: > { %s5287_s19 = sld [smem:[#allocation7_spill]]  ;;  %s5288_s26 = sld [smem:[#allocation5_spill]] }
0x1341   : > { %p4108_p1 = scmp.ge.s32.totalorder %s5287_s19, 2  ;;  %s3388_s28 = sand.u32 1, %s5288_s26  }
0x1342   : > { %s3389_s29 = scalar_lea.sflag [#allocation3], %s3388_s28 }
0x1343   : > { %p4105_p2 = pnand %p4108_p1, %p4384_p6 }
0x1345   : > { %4230 = dma.done.wait (!%p4105_p2), %s3389_s29, 128  }
0x1346   : > { %4232 = vsyncadd (!%p4105_p2), %s3389_s29, 4294967168  ;;  %s5290_s27 = sld [smem:[#allocation8_spill]]  ;;  %s5291_s0 = sld [smem:[#allocation6_spill]] }
0x1347   : > { %s5292_s26 = sld [smem:[#allocation9_spill]]  ;;  %s5293_s24 = smov %s4239_s25 }
0x134c   : > { %p27_p3 = scmp.ge.s32.totalorder %s5290_s27, 4   ;;  %s5294_s25 = smov %s5291_s0 }
0x134e   :  { %29 = sbr.rel (!%p27_p3) target bundleno = 9 (0x9), region = 138 }
0x1355   :  { %3394 = vsyncpa [#allocation3], 1 }
0x1356   :  { %3396 = vsyncpa [#allocation3 + $0x1], 1 }

</bundles_post_ra>
